<compile_context>
chip_gen: v5e
topology: v5e:2x2
jax: 0.10.0
libtpu: 0.0.40
codegen_flags: <defaults>
</compile_context>

<pallas_src>
import math

import jax
import jax.numpy as jnp
from jax.experimental import pallas as pl
from jax.experimental.pallas import tpu as pltpu


# ---------------------------------------------------------------------------
# Fused kernel: all LSTM layers + shared MLP + both heads.
# Kernel gate order (after wrapper reorder): i, f, o, g.
# ---------------------------------------------------------------------------
def _make_fused_kernel(T, B, H, num_layers):
    time_unroll = True if T <= 32 else 8

    def kernel(*refs):
        x_ref = refs[0]                                       # (T, B, I) bf16 time-major
        lstm_refs = [refs[1 + 3 * l: 4 + 3 * l] for l in range(num_layers)]
        base = 1 + 3 * num_layers
        w1_ref, b1_ref, w2_ref, b2_ref, wh_ref, bh_ref = refs[base:base + 6]
        out_ref = refs[base + 6]                              # (B, n_pad) f32
        gx_ref = refs[base + 7]                               # (T, B, 4H) bf16 scratch
        seq_ref = refs[base + 8]                              # (T, B, H)  bf16 scratch

        cur = x_ref[...]                                      # bf16 (T, B, I)
        h_last = None

        for layer in range(num_layers):
            wih_ref, whh_ref, b_ref = lstm_refs[layer]
            whh = whh_ref[...]                                # (H, 4H) bf16
            in_f = cur.shape[-1]

            # Hoisted input projection (+ folded b_ih + b_hh) for ALL timesteps:
            # one big bf16 MXU matmul outside the serial chain.
            gx_ref[...] = (
                jnp.dot(cur.reshape(T * B, in_f), wih_ref[...],
                        preferred_element_type=jnp.float32)
                + b_ref[...]
            ).reshape(T, B, 4 * H).astype(jnp.bfloat16)

            last_layer = layer == num_layers - 1

            def step(t, carry, whh=whh, last_layer=last_layer):
                h, c = carry                                  # f32 (B, H) carries
                gates = gx_ref[t].astype(jnp.float32) + jnp.dot(
                    h.astype(jnp.bfloat16), whh,
                    preferred_element_type=jnp.float32)       # f32 (B, 4H)
                sg = jax.nn.sigmoid(gates[:, :3 * H])         # i | f | o slab
                g_g = jnp.tanh(gates[:, 3 * H:])              # g slab
                c_new = sg[:, H:2 * H] * c + sg[:, :H] * g_g
                h_new = sg[:, 2 * H:] * jnp.tanh(c_new)
                if not last_layer:
                    seq_ref[t] = h_new.astype(jnp.bfloat16)   # full sequence out
                return h_new, c_new

            h_last, _ = jax.lax.fori_loop(
                0, T, step,
                (jnp.zeros((B, H), jnp.float32),
                 jnp.zeros((B, H), jnp.float32)),
                unroll=time_unroll)

            if not last_layer:
                cur = seq_ref[...]                            # next layer's input (bf16)

        # Shared MLP + fused heads (ReLU; dropout is identity at inference).
        # Intermediate widths are zero-padded to 128 lanes in the wrapper.
        h1 = jnp.maximum(
            jnp.dot(h_last.astype(jnp.bfloat16), w1_ref[...],
                    preferred_element_type=jnp.float32) + b1_ref[...], 0.0)
        h2 = jnp.maximum(
            jnp.dot(h1.astype(jnp.bfloat16), w2_ref[...],
                    preferred_element_type=jnp.float32) + b2_ref[...], 0.0)
        out_ref[...] = (
            jnp.dot(h2.astype(jnp.bfloat16), wh_ref[...],
                    preferred_element_type=jnp.float32) + bh_ref[...]
        ).astype(out_ref.dtype)

    return kernel


def _reorder_gates(w, H):
    # PyTorch gate order (i, f, g, o) -> kernel order (i, f, o, g): the three
    # sigmoid gates become one contiguous slab, tanh gets the trailing slab.
    return jnp.concatenate(
        [w[..., :2 * H], w[..., 3 * H:4 * H], w[..., 2 * H:3 * H]], axis=-1)


def _round_up(n, m):
    return ((n + m - 1) // m) * m


# ---------------------------------------------------------------------------
# Wrapper: pads batch into sublane-dense blocks (parallel grid axis), pads all
# MLP/head widths to 128 lanes, reorders gate columns, casts MXU operands to
# bf16 and calls the single fused pallas_call.
# ---------------------------------------------------------------------------
def deep_lstm_forward(x_bti, params):
    B, T, I = x_bti.shape
    H = params["lstm"][0][1].shape[0]
    num_layers = len(params["lstm"])
    LANE = 128

    # Batch blocking: blocks are multiples of 8 (sublane-dense), capped at 64;
    # the grid over blocks is "parallel" so v7x can split it across its 2 TCs.
    BBLK = min(max(8, _round_up(B, 8)), 64)
    Bp = _round_up(max(B, BBLK), BBLK)
    n_blocks = Bp // BBLK

    # Time-major, batch-padded, bf16 input built in one fused copy.
    x_tm = jnp.zeros((T, Bp, I), jnp.bfloat16).at[:, :B, :].set(
        jnp.transpose(x_bti, (1, 0, 2)).astype(jnp.bfloat16))

    lstm_inputs = []
    for wih_t, whh_t, b in params["lstm"]:
        lstm_inputs += [_reorder_gates(wih_t, H).astype(jnp.bfloat16),
                        _reorder_gates(whh_t, H).astype(jnp.bfloat16),
                        _reorder_gates(b, H)]                 # bias stays f32

    # MLP / head weights: lane-dense (128-wide) intermediates; both heads fused
    # into one padded output slab. Zero padding is exact (ReLU(0)=0, 0-rows).
    w1, b1, w2, b2, wl, bl, wc, bc = params["mlp"]
    h1_dim, h2_dim = w1.shape[1], w2.shape[1]                 # hidden//2, hidden//4
    n_label, n_corr = wl.shape[1], wc.shape[1]
    n_out = n_label + n_corr
    h1p = _round_up(max(h1_dim, LANE), LANE)
    h2p = _round_up(max(h2_dim, LANE), LANE)
    n_pad = _round_up(max(n_out, LANE), LANE)

    w1p = jnp.zeros((H, h1p), jnp.bfloat16).at[:, :h1_dim].set(
        w1.astype(jnp.bfloat16))
    b1p = jnp.zeros((1, h1p), jnp.float32).at[:, :h1_dim].set(b1[0])
    w2p = jnp.zeros((h1p, h2p), jnp.bfloat16).at[:h1_dim, :h2_dim].set(
        w2.astype(jnp.bfloat16))
    b2p = jnp.zeros((1, h2p), jnp.float32).at[:, :h2_dim].set(b2[0])
    whp = jnp.zeros((h2p, n_pad), jnp.bfloat16)
    whp = whp.at[:h2_dim, :n_label].set(wl.astype(jnp.bfloat16))
    whp = whp.at[:h2_dim, n_label:n_out].set(wc.astype(jnp.bfloat16))
    bhp = jnp.zeros((1, n_pad), jnp.float32)
    bhp = bhp.at[:, :n_label].set(bl[0]).at[:, n_label:n_out].set(bc[0])
    mlp_inputs = [w1p, b1p, w2p, b2p, whp, bhp]

    def _full_spec(arr):
        nd = arr.ndim
        return pl.BlockSpec(arr.shape, lambda b, nd=nd: (0,) * nd)

    in_specs = ([pl.BlockSpec((T, BBLK, I), lambda b: (0, b, 0))]
                + [_full_spec(a) for a in lstm_inputs]
                + [_full_spec(a) for a in mlp_inputs])
    out_spec = pl.BlockSpec((BBLK, n_pad), lambda b: (b, 0))

    out = pl.pallas_call(
        _make_fused_kernel(T, BBLK, H, num_layers),
        grid=(n_blocks,),
        out_shape=jax.ShapeDtypeStruct((Bp, n_pad), jnp.float32),
        in_specs=in_specs,
        out_specs=out_spec,
        scratch_shapes=[pltpu.VMEM((T, BBLK, 4 * H), jnp.bfloat16),   # gates_x
                        pltpu.VMEM((T, BBLK, H), jnp.bfloat16)],      # layer seq
        compiler_params=pltpu.CompilerParams(
            dimension_semantics=("parallel",)),
    )(x_tm, *lstm_inputs, *mlp_inputs)

    return out[:B, :n_label], out[:B, n_label:n_out]


# ---------------------------------------------------------------------------
# Parameter construction (PyTorch-shaped, deterministic, then transposed to
# (in_features, out_features); gate columns kept in standard (i,f,g,o) order —
# the wrapper reorders them for the kernel).
# ---------------------------------------------------------------------------
def init_params(key, input_size, hidden, num_layers, n_label, n_corr):
    def uni(k, shape, b):
        return jax.random.uniform(k, shape, jnp.float32, -b, b)

    lstm_bound = 1.0 / math.sqrt(hidden)
    lstm_layers = []
    for layer in range(num_layers):
        in_f = input_size if layer == 0 else hidden
        key, k1, k2, k3, k4 = jax.random.split(key, 5)
        wih = uni(k1, (4 * hidden, in_f), lstm_bound)    # weight_ih_l{k}
        whh = uni(k2, (4 * hidden, hidden), lstm_bound)  # weight_hh_l{k}
        bih = uni(k3, (4 * hidden,), lstm_bound)
        bhh = uni(k4, (4 * hidden,), lstm_bound)
        lstm_layers.append((wih.T, whh.T, (bih + bhh).reshape(1, -1)))

    def linear(key, in_f, out_f):
        b = 1.0 / math.sqrt(in_f)
        key, kw, kb = jax.random.split(key, 3)
        w = uni(kw, (out_f, in_f), b)                    # PyTorch Linear weight
        bias = uni(kb, (out_f,), b)
        return key, w.T, bias.reshape(1, -1)

    key, w1, b1 = linear(key, hidden, hidden // 2)       # shared_fc1
    key, w2, b2 = linear(key, hidden // 2, hidden // 4)  # shared_fc2
    key, wl, bl = linear(key, hidden // 4, n_label)      # label_head
    key, wc, bc = linear(key, hidden // 4, n_corr)       # correctness_head

    return {"lstm": lstm_layers, "mlp": (w1, b1, w2, b2, wl, bl, wc, bc)}


# ---------------------------------------------------------------------------
# Pure-JAX f32 reference (standard PyTorch gate order) for a sanity check.
# ---------------------------------------------------------------------------
def reference_forward(x_bti, params):
    h_seq = x_bti
    for wih_t, whh_t, b in params["lstm"]:
        B, T, _ = h_seq.shape
        H = whh_t.shape[0]
        h = jnp.zeros((B, H), jnp.float32)
        c = jnp.zeros((B, H), jnp.float32)
        outs = []
        for t in range(T):
            gates = h_seq[:, t, :] @ wih_t + h @ whh_t + b
            i_g = jax.nn.sigmoid(gates[:, 0:H])
            f_g = jax.nn.sigmoid(gates[:, H:2 * H])
            g_g = jnp.tanh(gates[:, 2 * H:3 * H])
            o_g = jax.nn.sigmoid(gates[:, 3 * H:4 * H])
            c = f_g * c + i_g * g_g
            h = o_g * jnp.tanh(c)
            outs.append(h)
        h_seq = jnp.stack(outs, axis=1)
    x = h_seq[:, -1, :]
    w1, b1, w2, b2, wl, bl, wc, bc = params["mlp"]
    x = jnp.maximum(x @ w1 + b1, 0.0)
    x = jnp.maximum(x @ w2 + b2, 0.0)
    return x @ wl + bl, x @ wc + bc


if __name__ == "__main__":
    # Model config (small, consistent with the module's forward).
    B, T = 2, 8
    input_size, hidden, num_layers = 16, 32, 2
    label_out, corr_out = 10, 2

    key = jax.random.PRNGKey(0)
    key, kx, kp = jax.random.split(key, 3)
    x = jax.random.normal(kx, (B, T, input_size), jnp.float32)
    params = init_params(kp, input_size, hidden, num_layers, label_out, corr_out)

    fwd = jax.jit(deep_lstm_forward)
    label_logits, corr_logits = fwd(x, params)
    label_logits = jax.block_until_ready(label_logits)
    corr_logits = jax.block_until_ready(corr_logits)

    assert label_logits.shape == (B, label_out)
    assert corr_logits.shape == (B, corr_out)

    # bf16 MXU paths -> tolerance widened vs. an all-f32 kernel.
    ref_label, ref_corr = reference_forward(x, params)
    assert jnp.allclose(label_logits, ref_label, atol=2e-2, rtol=2e-2)
    assert jnp.allclose(corr_logits, ref_corr, atol=2e-2, rtol=2e-2)

    print("KERNEL_OK")
</pallas_src>

<mosaic_0001>
module attributes {stable_mosaic.version = 11 : i64} {
  func.func @kernel(%arg0: i32, %arg1: memref<8x8x16xbf16, #tpu.memory_space<vmem>>, %arg2: memref<16x128xbf16, #tpu.memory_space<vmem>>, %arg3: memref<32x128xbf16, #tpu.memory_space<vmem>>, %arg4: memref<1x128xf32, #tpu.memory_space<vmem>>, %arg5: memref<32x128xbf16, #tpu.memory_space<vmem>>, %arg6: memref<32x128xbf16, #tpu.memory_space<vmem>>, %arg7: memref<1x128xf32, #tpu.memory_space<vmem>>, %arg8: memref<32x128xbf16, #tpu.memory_space<vmem>>, %arg9: memref<1x128xf32, #tpu.memory_space<vmem>>, %arg10: memref<128x128xbf16, #tpu.memory_space<vmem>>, %arg11: memref<1x128xf32, #tpu.memory_space<vmem>>, %arg12: memref<128x128xbf16, #tpu.memory_space<vmem>>, %arg13: memref<1x128xf32, #tpu.memory_space<vmem>>, %arg14: memref<8x128xf32, #tpu.memory_space<vmem>>, %arg15: memref<8x8x128xbf16, #tpu.memory_space<vmem>>, %arg16: memref<8x8x32xbf16, #tpu.memory_space<vmem>>) attributes {dimension_semantics = [#tpu.dimension_semantics<parallel>], iteration_bounds = array<i64: 1>, scalar_prefetch = 0 : i64, scratch_operands = 2 : i64, tpu.core_type = #tpu.core_type<tc>, window_params = [{transform_indices = @transform_0, window_bounds = array<i64: 8, 8, 16>}, {pipeline_mode = #tpu.pipeline_mode<synchronous>, transform_indices = @transform_1, window_bounds = array<i64: 16, 128>}, {pipeline_mode = #tpu.pipeline_mode<synchronous>, transform_indices = @transform_2, window_bounds = array<i64: 32, 128>}, {pipeline_mode = #tpu.pipeline_mode<synchronous>, transform_indices = @transform_3, window_bounds = array<i64: 1, 128>}, {pipeline_mode = #tpu.pipeline_mode<synchronous>, transform_indices = @transform_4, window_bounds = array<i64: 32, 128>}, {pipeline_mode = #tpu.pipeline_mode<synchronous>, transform_indices = @transform_5, window_bounds = array<i64: 32, 128>}, {pipeline_mode = #tpu.pipeline_mode<synchronous>, transform_indices = @transform_6, window_bounds = array<i64: 1, 128>}, {pipeline_mode = #tpu.pipeline_mode<synchronous>, transform_indices = @transform_7, window_bounds = array<i64: 32, 128>}, {pipeline_mode = #tpu.pipeline_mode<synchronous>, transform_indices = @transform_8, window_bounds = array<i64: 1, 128>}, {pipeline_mode = #tpu.pipeline_mode<synchronous>, transform_indices = @transform_9, window_bounds = array<i64: 128, 128>}, {pipeline_mode = #tpu.pipeline_mode<synchronous>, transform_indices = @transform_10, window_bounds = array<i64: 1, 128>}, {pipeline_mode = #tpu.pipeline_mode<synchronous>, transform_indices = @transform_11, window_bounds = array<i64: 128, 128>}, {pipeline_mode = #tpu.pipeline_mode<synchronous>, transform_indices = @transform_12, window_bounds = array<i64: 1, 128>}, {transform_indices = @transform_13, window_bounds = array<i64: 8, 128>}]} {
    %c0 = arith.constant 0 : index
    %c0_0 = arith.constant 0 : index
    %c0_1 = arith.constant 0 : index
    %0 = vector.load %arg1[%c0, %c0_0, %c0_1] : memref<8x8x16xbf16, #tpu.memory_space<vmem>>, vector<8x8x16xbf16>
    %c0_2 = arith.constant 0 : index
    %c0_3 = arith.constant 0 : index
    %1 = vector.load %arg3[%c0_2, %c0_3] : memref<32x128xbf16, #tpu.memory_space<vmem>>, vector<32x128xbf16>
    %2 = vector.shape_cast %0 : vector<8x8x16xbf16> to vector<64x16xbf16>
    %c0_4 = arith.constant 0 : index
    %c0_5 = arith.constant 0 : index
    %3 = vector.load %arg2[%c0_4, %c0_5] : memref<16x128xbf16, #tpu.memory_space<vmem>>, vector<16x128xbf16>
    %cst = arith.constant dense<0.000000e+00> : vector<64x128xf32>
    %4 = tpu.matmul %2, %3, %cst {dimension_numbers = #tpu.dot_dimension_numbers<[1], [0], [0], [1], [0, 0, 1, 1], [], []>} : vector<64x16xbf16>, vector<16x128xbf16>, vector<64x128xf32> -> vector<64x128xf32>
    %c0_6 = arith.constant 0 : index
    %c0_7 = arith.constant 0 : index
    %5 = vector.load %arg4[%c0_6, %c0_7] : memref<1x128xf32, #tpu.memory_space<vmem>>, vector<1x128xf32>
    %6 = vector.broadcast %5 : vector<1x128xf32> to vector<64x128xf32>
    %7 = arith.addf %4, %6 : vector<64x128xf32>
    %8 = vector.shape_cast %7 : vector<64x128xf32> to vector<8x8x128xf32>
    %9 = arith.truncf %8 : vector<8x8x128xf32> to vector<8x8x128xbf16>
    %c0_8 = arith.constant 0 : index
    %c0_9 = arith.constant 0 : index
    %c0_10 = arith.constant 0 : index
    %10 = vector.load %arg15[%c0_8, %c0_9, %c0_10] : memref<8x8x128xbf16, #tpu.memory_space<vmem>>, vector<8x8x128xbf16>
    tpu.vector_store %arg15[%c0_8, %c0_9, %c0_10], %9 {strides = array<i32>} : memref<8x8x128xbf16, #tpu.memory_space<vmem>>, vector<8x8x128xbf16>,
    %cst_11 = arith.constant 0.000000e+00 : f32
    %11 = vector.broadcast %cst_11 : f32 to vector<8x32xf32>
    %cst_12 = arith.constant 0.000000e+00 : f32
    %12 = vector.broadcast %cst_12 : f32 to vector<8x32xf32>
    %c0_i32 = arith.constant 0 : i32
    %13 = arith.index_cast %c0_i32 : i32 to index
    %c0_13 = arith.constant 0 : index
    %c0_14 = arith.constant 0 : index
    %14 = vector.load %arg15[%13, %c0_13, %c0_14] : memref<8x8x128xbf16, #tpu.memory_space<vmem>>, vector<1x8x128xbf16>
    %15 = vector.shape_cast %14 : vector<1x8x128xbf16> to vector<8x128xbf16>
    %16 = arith.extf %15 : vector<8x128xbf16> to vector<8x128xf32>
    %17 = arith.truncf %11 : vector<8x32xf32> to vector<8x32xbf16>
    %cst_15 = arith.constant dense<0.000000e+00> : vector<8x128xf32>
    %18 = tpu.matmul %17, %1, %cst_15 {dimension_numbers = #tpu.dot_dimension_numbers<[1], [0], [0], [1], [0, 0, 1, 1], [], []>} : vector<8x32xbf16>, vector<32x128xbf16>, vector<8x128xf32> -> vector<8x128xf32>
    %19 = arith.addf %16, %18 : vector<8x128xf32>
    %20 = vector.extract_strided_slice %19 {offsets = [0, 0], sizes = [8, 96], strides = [1, 1]} : vector<8x128xf32> to vector<8x96xf32>
    %21 = arith.negf %20 : vector<8x96xf32>
    %22 = math.exp %21 : vector<8x96xf32>
    %cst_16 = arith.constant 1.000000e+00 : f32
    %23 = vector.broadcast %cst_16 : f32 to vector<8x96xf32>
    %24 = arith.addf %23, %22 : vector<8x96xf32>
    %25 = arith.divf %23, %24 : vector<8x96xf32>
    %26 = vector.extract_strided_slice %19 {offsets = [0, 96], sizes = [8, 32], strides = [1, 1]} : vector<8x128xf32> to vector<8x32xf32>
    %27 = math.tanh %26 : vector<8x32xf32>
    %28 = vector.extract_strided_slice %25 {offsets = [0, 32], sizes = [8, 32], strides = [1, 1]} : vector<8x96xf32> to vector<8x32xf32>
    %29 = arith.mulf %28, %12 : vector<8x32xf32>
    %30 = vector.extract_strided_slice %25 {offsets = [0, 0], sizes = [8, 32], strides = [1, 1]} : vector<8x96xf32> to vector<8x32xf32>
    %31 = arith.mulf %30, %27 : vector<8x32xf32>
    %32 = arith.addf %29, %31 : vector<8x32xf32>
    %33 = vector.extract_strided_slice %25 {offsets = [0, 64], sizes = [8, 32], strides = [1, 1]} : vector<8x96xf32> to vector<8x32xf32>
    %34 = math.tanh %32 : vector<8x32xf32>
    %35 = arith.mulf %33, %34 : vector<8x32xf32>
    %36 = arith.truncf %35 : vector<8x32xf32> to vector<8x32xbf16>
    %37 = arith.index_cast %c0_i32 : i32 to index
    %c0_17 = arith.constant 0 : index
    %c0_18 = arith.constant 0 : index
    %38 = vector.load %arg16[%37, %c0_17, %c0_18] : memref<8x8x32xbf16, #tpu.memory_space<vmem>>, vector<1x8x32xbf16>
    %39 = vector.shape_cast %38 : vector<1x8x32xbf16> to vector<8x32xbf16>
    %40 = vector.shape_cast %36 : vector<8x32xbf16> to vector<1x8x32xbf16>
    tpu.vector_store %arg16[%37, %c0_17, %c0_18], %40 {strides = array<i32>} : memref<8x8x32xbf16, #tpu.memory_space<vmem>>, vector<1x8x32xbf16>,
    %c1_i32 = arith.constant 1 : i32
    %41 = arith.index_cast %c1_i32 : i32 to index
    %c0_19 = arith.constant 0 : index
    %c0_20 = arith.constant 0 : index
    %42 = vector.load %arg15[%41, %c0_19, %c0_20] : memref<8x8x128xbf16, #tpu.memory_space<vmem>>, vector<1x8x128xbf16>
    %43 = vector.shape_cast %42 : vector<1x8x128xbf16> to vector<8x128xbf16>
    %44 = arith.extf %43 : vector<8x128xbf16> to vector<8x128xf32>
    %45 = arith.truncf %35 : vector<8x32xf32> to vector<8x32xbf16>
    %cst_21 = arith.constant dense<0.000000e+00> : vector<8x128xf32>
    %46 = tpu.matmul %45, %1, %cst_21 {dimension_numbers = #tpu.dot_dimension_numbers<[1], [0], [0], [1], [0, 0, 1, 1], [], []>} : vector<8x32xbf16>, vector<32x128xbf16>, vector<8x128xf32> -> vector<8x128xf32>
    %47 = arith.addf %44, %46 : vector<8x128xf32>
    %48 = vector.extract_strided_slice %47 {offsets = [0, 0], sizes = [8, 96], strides = [1, 1]} : vector<8x128xf32> to vector<8x96xf32>
    %49 = arith.negf %48 : vector<8x96xf32>
    %50 = math.exp %49 : vector<8x96xf32>
    %cst_22 = arith.constant 1.000000e+00 : f32
    %51 = vector.broadcast %cst_22 : f32 to vector<8x96xf32>
    %52 = arith.addf %51, %50 : vector<8x96xf32>
    %53 = arith.divf %51, %52 : vector<8x96xf32>
    %54 = vector.extract_strided_slice %47 {offsets = [0, 96], sizes = [8, 32], strides = [1, 1]} : vector<8x128xf32> to vector<8x32xf32>
    %55 = math.tanh %54 : vector<8x32xf32>
    %56 = vector.extract_strided_slice %53 {offsets = [0, 32], sizes = [8, 32], strides = [1, 1]} : vector<8x96xf32> to vector<8x32xf32>
    %57 = arith.mulf %56, %32 : vector<8x32xf32>
    %58 = vector.extract_strided_slice %53 {offsets = [0, 0], sizes = [8, 32], strides = [1, 1]} : vector<8x96xf32> to vector<8x32xf32>
    %59 = arith.mulf %58, %55 : vector<8x32xf32>
    %60 = arith.addf %57, %59 : vector<8x32xf32>
    %61 = vector.extract_strided_slice %53 {offsets = [0, 64], sizes = [8, 32], strides = [1, 1]} : vector<8x96xf32> to vector<8x32xf32>
    %62 = math.tanh %60 : vector<8x32xf32>
    %63 = arith.mulf %61, %62 : vector<8x32xf32>
    %64 = arith.truncf %63 : vector<8x32xf32> to vector<8x32xbf16>
    %65 = arith.index_cast %c1_i32 : i32 to index
    %c0_23 = arith.constant 0 : index
    %c0_24 = arith.constant 0 : index
    %66 = vector.load %arg16[%65, %c0_23, %c0_24] : memref<8x8x32xbf16, #tpu.memory_space<vmem>>, vector<1x8x32xbf16>
    %67 = vector.shape_cast %66 : vector<1x8x32xbf16> to vector<8x32xbf16>
    %68 = vector.shape_cast %64 : vector<8x32xbf16> to vector<1x8x32xbf16>
    tpu.vector_store %arg16[%65, %c0_23, %c0_24], %68 {strides = array<i32>} : memref<8x8x32xbf16, #tpu.memory_space<vmem>>, vector<1x8x32xbf16>,
    %c2_i32 = arith.constant 2 : i32
    %69 = arith.index_cast %c2_i32 : i32 to index
    %c0_25 = arith.constant 0 : index
    %c0_26 = arith.constant 0 : index
    %70 = vector.load %arg15[%69, %c0_25, %c0_26] : memref<8x8x128xbf16, #tpu.memory_space<vmem>>, vector<1x8x128xbf16>
    %71 = vector.shape_cast %70 : vector<1x8x128xbf16> to vector<8x128xbf16>
    %72 = arith.extf %71 : vector<8x128xbf16> to vector<8x128xf32>
    %73 = arith.truncf %63 : vector<8x32xf32> to vector<8x32xbf16>
    %cst_27 = arith.constant dense<0.000000e+00> : vector<8x128xf32>
    %74 = tpu.matmul %73, %1, %cst_27 {dimension_numbers = #tpu.dot_dimension_numbers<[1], [0], [0], [1], [0, 0, 1, 1], [], []>} : vector<8x32xbf16>, vector<32x128xbf16>, vector<8x128xf32> -> vector<8x128xf32>
    %75 = arith.addf %72, %74 : vector<8x128xf32>
    %76 = vector.extract_strided_slice %75 {offsets = [0, 0], sizes = [8, 96], strides = [1, 1]} : vector<8x128xf32> to vector<8x96xf32>
    %77 = arith.negf %76 : vector<8x96xf32>
    %78 = math.exp %77 : vector<8x96xf32>
    %cst_28 = arith.constant 1.000000e+00 : f32
    %79 = vector.broadcast %cst_28 : f32 to vector<8x96xf32>
    %80 = arith.addf %79, %78 : vector<8x96xf32>
    %81 = arith.divf %79, %80 : vector<8x96xf32>
    %82 = vector.extract_strided_slice %75 {offsets = [0, 96], sizes = [8, 32], strides = [1, 1]} : vector<8x128xf32> to vector<8x32xf32>
    %83 = math.tanh %82 : vector<8x32xf32>
    %84 = vector.extract_strided_slice %81 {offsets = [0, 32], sizes = [8, 32], strides = [1, 1]} : vector<8x96xf32> to vector<8x32xf32>
    %85 = arith.mulf %84, %60 : vector<8x32xf32>
    %86 = vector.extract_strided_slice %81 {offsets = [0, 0], sizes = [8, 32], strides = [1, 1]} : vector<8x96xf32> to vector<8x32xf32>
    %87 = arith.mulf %86, %83 : vector<8x32xf32>
    %88 = arith.addf %85, %87 : vector<8x32xf32>
    %89 = vector.extract_strided_slice %81 {offsets = [0, 64], sizes = [8, 32], strides = [1, 1]} : vector<8x96xf32> to vector<8x32xf32>
    %90 = math.tanh %88 : vector<8x32xf32>
    %91 = arith.mulf %89, %90 : vector<8x32xf32>
    %92 = arith.truncf %91 : vector<8x32xf32> to vector<8x32xbf16>
    %93 = arith.index_cast %c2_i32 : i32 to index
    %c0_29 = arith.constant 0 : index
    %c0_30 = arith.constant 0 : index
    %94 = vector.load %arg16[%93, %c0_29, %c0_30] : memref<8x8x32xbf16, #tpu.memory_space<vmem>>, vector<1x8x32xbf16>
    %95 = vector.shape_cast %94 : vector<1x8x32xbf16> to vector<8x32xbf16>
    %96 = vector.shape_cast %92 : vector<8x32xbf16> to vector<1x8x32xbf16>
    tpu.vector_store %arg16[%93, %c0_29, %c0_30], %96 {strides = array<i32>} : memref<8x8x32xbf16, #tpu.memory_space<vmem>>, vector<1x8x32xbf16>,
    %c3_i32 = arith.constant 3 : i32
    %97 = arith.index_cast %c3_i32 : i32 to index
    %c0_31 = arith.constant 0 : index
    %c0_32 = arith.constant 0 : index
    %98 = vector.load %arg15[%97, %c0_31, %c0_32] : memref<8x8x128xbf16, #tpu.memory_space<vmem>>, vector<1x8x128xbf16>
    %99 = vector.shape_cast %98 : vector<1x8x128xbf16> to vector<8x128xbf16>
    %100 = arith.extf %99 : vector<8x128xbf16> to vector<8x128xf32>
    %101 = arith.truncf %91 : vector<8x32xf32> to vector<8x32xbf16>
    %cst_33 = arith.constant dense<0.000000e+00> : vector<8x128xf32>
    %102 = tpu.matmul %101, %1, %cst_33 {dimension_numbers = #tpu.dot_dimension_numbers<[1], [0], [0], [1], [0, 0, 1, 1], [], []>} : vector<8x32xbf16>, vector<32x128xbf16>, vector<8x128xf32> -> vector<8x128xf32>
    %103 = arith.addf %100, %102 : vector<8x128xf32>
    %104 = vector.extract_strided_slice %103 {offsets = [0, 0], sizes = [8, 96], strides = [1, 1]} : vector<8x128xf32> to vector<8x96xf32>
    %105 = arith.negf %104 : vector<8x96xf32>
    %106 = math.exp %105 : vector<8x96xf32>
    %cst_34 = arith.constant 1.000000e+00 : f32
    %107 = vector.broadcast %cst_34 : f32 to vector<8x96xf32>
    %108 = arith.addf %107, %106 : vector<8x96xf32>
    %109 = arith.divf %107, %108 : vector<8x96xf32>
    %110 = vector.extract_strided_slice %103 {offsets = [0, 96], sizes = [8, 32], strides = [1, 1]} : vector<8x128xf32> to vector<8x32xf32>
    %111 = math.tanh %110 : vector<8x32xf32>
    %112 = vector.extract_strided_slice %109 {offsets = [0, 32], sizes = [8, 32], strides = [1, 1]} : vector<8x96xf32> to vector<8x32xf32>
    %113 = arith.mulf %112, %88 : vector<8x32xf32>
    %114 = vector.extract_strided_slice %109 {offsets = [0, 0], sizes = [8, 32], strides = [1, 1]} : vector<8x96xf32> to vector<8x32xf32>
    %115 = arith.mulf %114, %111 : vector<8x32xf32>
    %116 = arith.addf %113, %115 : vector<8x32xf32>
    %117 = vector.extract_strided_slice %109 {offsets = [0, 64], sizes = [8, 32], strides = [1, 1]} : vector<8x96xf32> to vector<8x32xf32>
    %118 = math.tanh %116 : vector<8x32xf32>
    %119 = arith.mulf %117, %118 : vector<8x32xf32>
    %120 = arith.truncf %119 : vector<8x32xf32> to vector<8x32xbf16>
    %121 = arith.index_cast %c3_i32 : i32 to index
    %c0_35 = arith.constant 0 : index
    %c0_36 = arith.constant 0 : index
    %122 = vector.load %arg16[%121, %c0_35, %c0_36] : memref<8x8x32xbf16, #tpu.memory_space<vmem>>, vector<1x8x32xbf16>
    %123 = vector.shape_cast %122 : vector<1x8x32xbf16> to vector<8x32xbf16>
    %124 = vector.shape_cast %120 : vector<8x32xbf16> to vector<1x8x32xbf16>
    tpu.vector_store %arg16[%121, %c0_35, %c0_36], %124 {strides = array<i32>} : memref<8x8x32xbf16, #tpu.memory_space<vmem>>, vector<1x8x32xbf16>,
    %c4_i32 = arith.constant 4 : i32
    %125 = arith.index_cast %c4_i32 : i32 to index
    %c0_37 = arith.constant 0 : index
    %c0_38 = arith.constant 0 : index
    %126 = vector.load %arg15[%125, %c0_37, %c0_38] : memref<8x8x128xbf16, #tpu.memory_space<vmem>>, vector<1x8x128xbf16>
    %127 = vector.shape_cast %126 : vector<1x8x128xbf16> to vector<8x128xbf16>
    %128 = arith.extf %127 : vector<8x128xbf16> to vector<8x128xf32>
    %129 = arith.truncf %119 : vector<8x32xf32> to vector<8x32xbf16>
    %cst_39 = arith.constant dense<0.000000e+00> : vector<8x128xf32>
    %130 = tpu.matmul %129, %1, %cst_39 {dimension_numbers = #tpu.dot_dimension_numbers<[1], [0], [0], [1], [0, 0, 1, 1], [], []>} : vector<8x32xbf16>, vector<32x128xbf16>, vector<8x128xf32> -> vector<8x128xf32>
    %131 = arith.addf %128, %130 : vector<8x128xf32>
    %132 = vector.extract_strided_slice %131 {offsets = [0, 0], sizes = [8, 96], strides = [1, 1]} : vector<8x128xf32> to vector<8x96xf32>
    %133 = arith.negf %132 : vector<8x96xf32>
    %134 = math.exp %133 : vector<8x96xf32>
    %cst_40 = arith.constant 1.000000e+00 : f32
    %135 = vector.broadcast %cst_40 : f32 to vector<8x96xf32>
    %136 = arith.addf %135, %134 : vector<8x96xf32>
    %137 = arith.divf %135, %136 : vector<8x96xf32>
    %138 = vector.extract_strided_slice %131 {offsets = [0, 96], sizes = [8, 32], strides = [1, 1]} : vector<8x128xf32> to vector<8x32xf32>
    %139 = math.tanh %138 : vector<8x32xf32>
    %140 = vector.extract_strided_slice %137 {offsets = [0, 32], sizes = [8, 32], strides = [1, 1]} : vector<8x96xf32> to vector<8x32xf32>
    %141 = arith.mulf %140, %116 : vector<8x32xf32>
    %142 = vector.extract_strided_slice %137 {offsets = [0, 0], sizes = [8, 32], strides = [1, 1]} : vector<8x96xf32> to vector<8x32xf32>
    %143 = arith.mulf %142, %139 : vector<8x32xf32>
    %144 = arith.addf %141, %143 : vector<8x32xf32>
    %145 = vector.extract_strided_slice %137 {offsets = [0, 64], sizes = [8, 32], strides = [1, 1]} : vector<8x96xf32> to vector<8x32xf32>
    %146 = math.tanh %144 : vector<8x32xf32>
    %147 = arith.mulf %145, %146 : vector<8x32xf32>
    %148 = arith.truncf %147 : vector<8x32xf32> to vector<8x32xbf16>
    %149 = arith.index_cast %c4_i32 : i32 to index
    %c0_41 = arith.constant 0 : index
    %c0_42 = arith.constant 0 : index
    %150 = vector.load %arg16[%149, %c0_41, %c0_42] : memref<8x8x32xbf16, #tpu.memory_space<vmem>>, vector<1x8x32xbf16>
    %151 = vector.shape_cast %150 : vector<1x8x32xbf16> to vector<8x32xbf16>
    %152 = vector.shape_cast %148 : vector<8x32xbf16> to vector<1x8x32xbf16>
    tpu.vector_store %arg16[%149, %c0_41, %c0_42], %152 {strides = array<i32>} : memref<8x8x32xbf16, #tpu.memory_space<vmem>>, vector<1x8x32xbf16>,
    %c5_i32 = arith.constant 5 : i32
    %153 = arith.index_cast %c5_i32 : i32 to index
    %c0_43 = arith.constant 0 : index
    %c0_44 = arith.constant 0 : index
    %154 = vector.load %arg15[%153, %c0_43, %c0_44] : memref<8x8x128xbf16, #tpu.memory_space<vmem>>, vector<1x8x128xbf16>
    %155 = vector.shape_cast %154 : vector<1x8x128xbf16> to vector<8x128xbf16>
    %156 = arith.extf %155 : vector<8x128xbf16> to vector<8x128xf32>
    %157 = arith.truncf %147 : vector<8x32xf32> to vector<8x32xbf16>
    %cst_45 = arith.constant dense<0.000000e+00> : vector<8x128xf32>
    %158 = tpu.matmul %157, %1, %cst_45 {dimension_numbers = #tpu.dot_dimension_numbers<[1], [0], [0], [1], [0, 0, 1, 1], [], []>} : vector<8x32xbf16>, vector<32x128xbf16>, vector<8x128xf32> -> vector<8x128xf32>
    %159 = arith.addf %156, %158 : vector<8x128xf32>
    %160 = vector.extract_strided_slice %159 {offsets = [0, 0], sizes = [8, 96], strides = [1, 1]} : vector<8x128xf32> to vector<8x96xf32>
    %161 = arith.negf %160 : vector<8x96xf32>
    %162 = math.exp %161 : vector<8x96xf32>
    %cst_46 = arith.constant 1.000000e+00 : f32
    %163 = vector.broadcast %cst_46 : f32 to vector<8x96xf32>
    %164 = arith.addf %163, %162 : vector<8x96xf32>
    %165 = arith.divf %163, %164 : vector<8x96xf32>
    %166 = vector.extract_strided_slice %159 {offsets = [0, 96], sizes = [8, 32], strides = [1, 1]} : vector<8x128xf32> to vector<8x32xf32>
    %167 = math.tanh %166 : vector<8x32xf32>
    %168 = vector.extract_strided_slice %165 {offsets = [0, 32], sizes = [8, 32], strides = [1, 1]} : vector<8x96xf32> to vector<8x32xf32>
    %169 = arith.mulf %168, %144 : vector<8x32xf32>
    %170 = vector.extract_strided_slice %165 {offsets = [0, 0], sizes = [8, 32], strides = [1, 1]} : vector<8x96xf32> to vector<8x32xf32>
    %171 = arith.mulf %170, %167 : vector<8x32xf32>
    %172 = arith.addf %169, %171 : vector<8x32xf32>
    %173 = vector.extract_strided_slice %165 {offsets = [0, 64], sizes = [8, 32], strides = [1, 1]} : vector<8x96xf32> to vector<8x32xf32>
    %174 = math.tanh %172 : vector<8x32xf32>
    %175 = arith.mulf %173, %174 : vector<8x32xf32>
    %176 = arith.truncf %175 : vector<8x32xf32> to vector<8x32xbf16>
    %177 = arith.index_cast %c5_i32 : i32 to index
    %c0_47 = arith.constant 0 : index
    %c0_48 = arith.constant 0 : index
    %178 = vector.load %arg16[%177, %c0_47, %c0_48] : memref<8x8x32xbf16, #tpu.memory_space<vmem>>, vector<1x8x32xbf16>
    %179 = vector.shape_cast %178 : vector<1x8x32xbf16> to vector<8x32xbf16>
    %180 = vector.shape_cast %176 : vector<8x32xbf16> to vector<1x8x32xbf16>
    tpu.vector_store %arg16[%177, %c0_47, %c0_48], %180 {strides = array<i32>} : memref<8x8x32xbf16, #tpu.memory_space<vmem>>, vector<1x8x32xbf16>,
    %c6_i32 = arith.constant 6 : i32
    %181 = arith.index_cast %c6_i32 : i32 to index
    %c0_49 = arith.constant 0 : index
    %c0_50 = arith.constant 0 : index
    %182 = vector.load %arg15[%181, %c0_49, %c0_50] : memref<8x8x128xbf16, #tpu.memory_space<vmem>>, vector<1x8x128xbf16>
    %183 = vector.shape_cast %182 : vector<1x8x128xbf16> to vector<8x128xbf16>
    %184 = arith.extf %183 : vector<8x128xbf16> to vector<8x128xf32>
    %185 = arith.truncf %175 : vector<8x32xf32> to vector<8x32xbf16>
    %cst_51 = arith.constant dense<0.000000e+00> : vector<8x128xf32>
    %186 = tpu.matmul %185, %1, %cst_51 {dimension_numbers = #tpu.dot_dimension_numbers<[1], [0], [0], [1], [0, 0, 1, 1], [], []>} : vector<8x32xbf16>, vector<32x128xbf16>, vector<8x128xf32> -> vector<8x128xf32>
    %187 = arith.addf %184, %186 : vector<8x128xf32>
    %188 = vector.extract_strided_slice %187 {offsets = [0, 0], sizes = [8, 96], strides = [1, 1]} : vector<8x128xf32> to vector<8x96xf32>
    %189 = arith.negf %188 : vector<8x96xf32>
    %190 = math.exp %189 : vector<8x96xf32>
    %cst_52 = arith.constant 1.000000e+00 : f32
    %191 = vector.broadcast %cst_52 : f32 to vector<8x96xf32>
    %192 = arith.addf %191, %190 : vector<8x96xf32>
    %193 = arith.divf %191, %192 : vector<8x96xf32>
    %194 = vector.extract_strided_slice %187 {offsets = [0, 96], sizes = [8, 32], strides = [1, 1]} : vector<8x128xf32> to vector<8x32xf32>
    %195 = math.tanh %194 : vector<8x32xf32>
    %196 = vector.extract_strided_slice %193 {offsets = [0, 32], sizes = [8, 32], strides = [1, 1]} : vector<8x96xf32> to vector<8x32xf32>
    %197 = arith.mulf %196, %172 : vector<8x32xf32>
    %198 = vector.extract_strided_slice %193 {offsets = [0, 0], sizes = [8, 32], strides = [1, 1]} : vector<8x96xf32> to vector<8x32xf32>
    %199 = arith.mulf %198, %195 : vector<8x32xf32>
    %200 = arith.addf %197, %199 : vector<8x32xf32>
    %201 = vector.extract_strided_slice %193 {offsets = [0, 64], sizes = [8, 32], strides = [1, 1]} : vector<8x96xf32> to vector<8x32xf32>
    %202 = math.tanh %200 : vector<8x32xf32>
    %203 = arith.mulf %201, %202 : vector<8x32xf32>
    %204 = arith.truncf %203 : vector<8x32xf32> to vector<8x32xbf16>
    %205 = arith.index_cast %c6_i32 : i32 to index
    %c0_53 = arith.constant 0 : index
    %c0_54 = arith.constant 0 : index
    %206 = vector.load %arg16[%205, %c0_53, %c0_54] : memref<8x8x32xbf16, #tpu.memory_space<vmem>>, vector<1x8x32xbf16>
    %207 = vector.shape_cast %206 : vector<1x8x32xbf16> to vector<8x32xbf16>
    %208 = vector.shape_cast %204 : vector<8x32xbf16> to vector<1x8x32xbf16>
    tpu.vector_store %arg16[%205, %c0_53, %c0_54], %208 {strides = array<i32>} : memref<8x8x32xbf16, #tpu.memory_space<vmem>>, vector<1x8x32xbf16>,
    %c7_i32 = arith.constant 7 : i32
    %209 = arith.index_cast %c7_i32 : i32 to index
    %c0_55 = arith.constant 0 : index
    %c0_56 = arith.constant 0 : index
    %210 = vector.load %arg15[%209, %c0_55, %c0_56] : memref<8x8x128xbf16, #tpu.memory_space<vmem>>, vector<1x8x128xbf16>
    %211 = vector.shape_cast %210 : vector<1x8x128xbf16> to vector<8x128xbf16>
    %212 = arith.extf %211 : vector<8x128xbf16> to vector<8x128xf32>
    %213 = arith.truncf %203 : vector<8x32xf32> to vector<8x32xbf16>
    %cst_57 = arith.constant dense<0.000000e+00> : vector<8x128xf32>
    %214 = tpu.matmul %213, %1, %cst_57 {dimension_numbers = #tpu.dot_dimension_numbers<[1], [0], [0], [1], [0, 0, 1, 1], [], []>} : vector<8x32xbf16>, vector<32x128xbf16>, vector<8x128xf32> -> vector<8x128xf32>
    %215 = arith.addf %212, %214 : vector<8x128xf32>
    %216 = vector.extract_strided_slice %215 {offsets = [0, 0], sizes = [8, 96], strides = [1, 1]} : vector<8x128xf32> to vector<8x96xf32>
    %217 = arith.negf %216 : vector<8x96xf32>
    %218 = math.exp %217 : vector<8x96xf32>
    %cst_58 = arith.constant 1.000000e+00 : f32
    %219 = vector.broadcast %cst_58 : f32 to vector<8x96xf32>
    %220 = arith.addf %219, %218 : vector<8x96xf32>
    %221 = arith.divf %219, %220 : vector<8x96xf32>
    %222 = vector.extract_strided_slice %215 {offsets = [0, 96], sizes = [8, 32], strides = [1, 1]} : vector<8x128xf32> to vector<8x32xf32>
    %223 = math.tanh %222 : vector<8x32xf32>
    %224 = vector.extract_strided_slice %221 {offsets = [0, 32], sizes = [8, 32], strides = [1, 1]} : vector<8x96xf32> to vector<8x32xf32>
    %225 = arith.mulf %224, %200 : vector<8x32xf32>
    %226 = vector.extract_strided_slice %221 {offsets = [0, 0], sizes = [8, 32], strides = [1, 1]} : vector<8x96xf32> to vector<8x32xf32>
    %227 = arith.mulf %226, %223 : vector<8x32xf32>
    %228 = arith.addf %225, %227 : vector<8x32xf32>
    %229 = vector.extract_strided_slice %221 {offsets = [0, 64], sizes = [8, 32], strides = [1, 1]} : vector<8x96xf32> to vector<8x32xf32>
    %230 = math.tanh %228 : vector<8x32xf32>
    %231 = arith.mulf %229, %230 : vector<8x32xf32>
    %232 = arith.truncf %231 : vector<8x32xf32> to vector<8x32xbf16>
    %233 = arith.index_cast %c7_i32 : i32 to index
    %c0_59 = arith.constant 0 : index
    %c0_60 = arith.constant 0 : index
    %234 = vector.load %arg16[%233, %c0_59, %c0_60] : memref<8x8x32xbf16, #tpu.memory_space<vmem>>, vector<1x8x32xbf16>
    %235 = vector.shape_cast %234 : vector<1x8x32xbf16> to vector<8x32xbf16>
    %236 = vector.shape_cast %232 : vector<8x32xbf16> to vector<1x8x32xbf16>
    tpu.vector_store %arg16[%233, %c0_59, %c0_60], %236 {strides = array<i32>} : memref<8x8x32xbf16, #tpu.memory_space<vmem>>, vector<1x8x32xbf16>,
    %c8_i32 = arith.constant 8 : i32
    %c0_61 = arith.constant 0 : index
    %c0_62 = arith.constant 0 : index
    %c0_63 = arith.constant 0 : index
    %237 = vector.load %arg16[%c0_61, %c0_62, %c0_63] : memref<8x8x32xbf16, #tpu.memory_space<vmem>>, vector<8x8x32xbf16>
    %c0_64 = arith.constant 0 : index
    %c0_65 = arith.constant 0 : index
    %238 = vector.load %arg6[%c0_64, %c0_65] : memref<32x128xbf16, #tpu.memory_space<vmem>>, vector<32x128xbf16>
    %239 = vector.shape_cast %237 : vector<8x8x32xbf16> to vector<64x32xbf16>
    %c0_66 = arith.constant 0 : index
    %c0_67 = arith.constant 0 : index
    %240 = vector.load %arg5[%c0_66, %c0_67] : memref<32x128xbf16, #tpu.memory_space<vmem>>, vector<32x128xbf16>
    %cst_68 = arith.constant dense<0.000000e+00> : vector<64x128xf32>
    %241 = tpu.matmul %239, %240, %cst_68 {dimension_numbers = #tpu.dot_dimension_numbers<[1], [0], [0], [1], [0, 0, 1, 1], [], []>} : vector<64x32xbf16>, vector<32x128xbf16>, vector<64x128xf32> -> vector<64x128xf32>
    %c0_69 = arith.constant 0 : index
    %c0_70 = arith.constant 0 : index
    %242 = vector.load %arg7[%c0_69, %c0_70] : memref<1x128xf32, #tpu.memory_space<vmem>>, vector<1x128xf32>
    %243 = vector.broadcast %242 : vector<1x128xf32> to vector<64x128xf32>
    %244 = arith.addf %241, %243 : vector<64x128xf32>
    %245 = vector.shape_cast %244 : vector<64x128xf32> to vector<8x8x128xf32>
    %246 = arith.truncf %245 : vector<8x8x128xf32> to vector<8x8x128xbf16>
    %c0_71 = arith.constant 0 : index
    %c0_72 = arith.constant 0 : index
    %c0_73 = arith.constant 0 : index
    %247 = vector.load %arg15[%c0_71, %c0_72, %c0_73] : memref<8x8x128xbf16, #tpu.memory_space<vmem>>, vector<8x8x128xbf16>
    tpu.vector_store %arg15[%c0_71, %c0_72, %c0_73], %246 {strides = array<i32>} : memref<8x8x128xbf16, #tpu.memory_space<vmem>>, vector<8x8x128xbf16>,
    %cst_74 = arith.constant 0.000000e+00 : f32
    %248 = vector.broadcast %cst_74 : f32 to vector<8x32xf32>
    %cst_75 = arith.constant 0.000000e+00 : f32
    %249 = vector.broadcast %cst_75 : f32 to vector<8x32xf32>
    %c0_i32_76 = arith.constant 0 : i32
    %250 = arith.index_cast %c0_i32_76 : i32 to index
    %c0_77 = arith.constant 0 : index
    %c0_78 = arith.constant 0 : index
    %251 = vector.load %arg15[%250, %c0_77, %c0_78] : memref<8x8x128xbf16, #tpu.memory_space<vmem>>, vector<1x8x128xbf16>
    %252 = vector.shape_cast %251 : vector<1x8x128xbf16> to vector<8x128xbf16>
    %253 = arith.extf %252 : vector<8x128xbf16> to vector<8x128xf32>
    %254 = arith.truncf %248 : vector<8x32xf32> to vector<8x32xbf16>
    %cst_79 = arith.constant dense<0.000000e+00> : vector<8x128xf32>
    %255 = tpu.matmul %254, %238, %cst_79 {dimension_numbers = #tpu.dot_dimension_numbers<[1], [0], [0], [1], [0, 0, 1, 1], [], []>} : vector<8x32xbf16>, vector<32x128xbf16>, vector<8x128xf32> -> vector<8x128xf32>
    %256 = arith.addf %253, %255 : vector<8x128xf32>
    %257 = vector.extract_strided_slice %256 {offsets = [0, 0], sizes = [8, 96], strides = [1, 1]} : vector<8x128xf32> to vector<8x96xf32>
    %258 = arith.negf %257 : vector<8x96xf32>
    %259 = math.exp %258 : vector<8x96xf32>
    %cst_80 = arith.constant 1.000000e+00 : f32
    %260 = vector.broadcast %cst_80 : f32 to vector<8x96xf32>
    %261 = arith.addf %260, %259 : vector<8x96xf32>
    %262 = arith.divf %260, %261 : vector<8x96xf32>
    %263 = vector.extract_strided_slice %256 {offsets = [0, 96], sizes = [8, 32], strides = [1, 1]} : vector<8x128xf32> to vector<8x32xf32>
    %264 = math.tanh %263 : vector<8x32xf32>
    %265 = vector.extract_strided_slice %262 {offsets = [0, 32], sizes = [8, 32], strides = [1, 1]} : vector<8x96xf32> to vector<8x32xf32>
    %266 = arith.mulf %265, %249 : vector<8x32xf32>
    %267 = vector.extract_strided_slice %262 {offsets = [0, 0], sizes = [8, 32], strides = [1, 1]} : vector<8x96xf32> to vector<8x32xf32>
    %268 = arith.mulf %267, %264 : vector<8x32xf32>
    %269 = arith.addf %266, %268 : vector<8x32xf32>
    %270 = vector.extract_strided_slice %262 {offsets = [0, 64], sizes = [8, 32], strides = [1, 1]} : vector<8x96xf32> to vector<8x32xf32>
    %271 = math.tanh %269 : vector<8x32xf32>
    %272 = arith.mulf %270, %271 : vector<8x32xf32>
    %c1_i32_81 = arith.constant 1 : i32
    %273 = arith.index_cast %c1_i32_81 : i32 to index
    %c0_82 = arith.constant 0 : index
    %c0_83 = arith.constant 0 : index
    %274 = vector.load %arg15[%273, %c0_82, %c0_83] : memref<8x8x128xbf16, #tpu.memory_space<vmem>>, vector<1x8x128xbf16>
    %275 = vector.shape_cast %274 : vector<1x8x128xbf16> to vector<8x128xbf16>
    %276 = arith.extf %275 : vector<8x128xbf16> to vector<8x128xf32>
    %277 = arith.truncf %272 : vector<8x32xf32> to vector<8x32xbf16>
    %cst_84 = arith.constant dense<0.000000e+00> : vector<8x128xf32>
    %278 = tpu.matmul %277, %238, %cst_84 {dimension_numbers = #tpu.dot_dimension_numbers<[1], [0], [0], [1], [0, 0, 1, 1], [], []>} : vector<8x32xbf16>, vector<32x128xbf16>, vector<8x128xf32> -> vector<8x128xf32>
    %279 = arith.addf %276, %278 : vector<8x128xf32>
    %280 = vector.extract_strided_slice %279 {offsets = [0, 0], sizes = [8, 96], strides = [1, 1]} : vector<8x128xf32> to vector<8x96xf32>
    %281 = arith.negf %280 : vector<8x96xf32>
    %282 = math.exp %281 : vector<8x96xf32>
    %cst_85 = arith.constant 1.000000e+00 : f32
    %283 = vector.broadcast %cst_85 : f32 to vector<8x96xf32>
    %284 = arith.addf %283, %282 : vector<8x96xf32>
    %285 = arith.divf %283, %284 : vector<8x96xf32>
    %286 = vector.extract_strided_slice %279 {offsets = [0, 96], sizes = [8, 32], strides = [1, 1]} : vector<8x128xf32> to vector<8x32xf32>
    %287 = math.tanh %286 : vector<8x32xf32>
    %288 = vector.extract_strided_slice %285 {offsets = [0, 32], sizes = [8, 32], strides = [1, 1]} : vector<8x96xf32> to vector<8x32xf32>
    %289 = arith.mulf %288, %269 : vector<8x32xf32>
    %290 = vector.extract_strided_slice %285 {offsets = [0, 0], sizes = [8, 32], strides = [1, 1]} : vector<8x96xf32> to vector<8x32xf32>
    %291 = arith.mulf %290, %287 : vector<8x32xf32>
    %292 = arith.addf %289, %291 : vector<8x32xf32>
    %293 = vector.extract_strided_slice %285 {offsets = [0, 64], sizes = [8, 32], strides = [1, 1]} : vector<8x96xf32> to vector<8x32xf32>
    %294 = math.tanh %292 : vector<8x32xf32>
    %295 = arith.mulf %293, %294 : vector<8x32xf32>
    %c2_i32_86 = arith.constant 2 : i32
    %296 = arith.index_cast %c2_i32_86 : i32 to index
    %c0_87 = arith.constant 0 : index
    %c0_88 = arith.constant 0 : index
    %297 = vector.load %arg15[%296, %c0_87, %c0_88] : memref<8x8x128xbf16, #tpu.memory_space<vmem>>, vector<1x8x128xbf16>
    %298 = vector.shape_cast %297 : vector<1x8x128xbf16> to vector<8x128xbf16>
    %299 = arith.extf %298 : vector<8x128xbf16> to vector<8x128xf32>
    %300 = arith.truncf %295 : vector<8x32xf32> to vector<8x32xbf16>
    %cst_89 = arith.constant dense<0.000000e+00> : vector<8x128xf32>
    %301 = tpu.matmul %300, %238, %cst_89 {dimension_numbers = #tpu.dot_dimension_numbers<[1], [0], [0], [1], [0, 0, 1, 1], [], []>} : vector<8x32xbf16>, vector<32x128xbf16>, vector<8x128xf32> -> vector<8x128xf32>
    %302 = arith.addf %299, %301 : vector<8x128xf32>
    %303 = vector.extract_strided_slice %302 {offsets = [0, 0], sizes = [8, 96], strides = [1, 1]} : vector<8x128xf32> to vector<8x96xf32>
    %304 = arith.negf %303 : vector<8x96xf32>
    %305 = math.exp %304 : vector<8x96xf32>
    %cst_90 = arith.constant 1.000000e+00 : f32
    %306 = vector.broadcast %cst_90 : f32 to vector<8x96xf32>
    %307 = arith.addf %306, %305 : vector<8x96xf32>
    %308 = arith.divf %306, %307 : vector<8x96xf32>
    %309 = vector.extract_strided_slice %302 {offsets = [0, 96], sizes = [8, 32], strides = [1, 1]} : vector<8x128xf32> to vector<8x32xf32>
    %310 = math.tanh %309 : vector<8x32xf32>
    %311 = vector.extract_strided_slice %308 {offsets = [0, 32], sizes = [8, 32], strides = [1, 1]} : vector<8x96xf32> to vector<8x32xf32>
    %312 = arith.mulf %311, %292 : vector<8x32xf32>
    %313 = vector.extract_strided_slice %308 {offsets = [0, 0], sizes = [8, 32], strides = [1, 1]} : vector<8x96xf32> to vector<8x32xf32>
    %314 = arith.mulf %313, %310 : vector<8x32xf32>
    %315 = arith.addf %312, %314 : vector<8x32xf32>
    %316 = vector.extract_strided_slice %308 {offsets = [0, 64], sizes = [8, 32], strides = [1, 1]} : vector<8x96xf32> to vector<8x32xf32>
    %317 = math.tanh %315 : vector<8x32xf32>
    %318 = arith.mulf %316, %317 : vector<8x32xf32>
    %c3_i32_91 = arith.constant 3 : i32
    %319 = arith.index_cast %c3_i32_91 : i32 to index
    %c0_92 = arith.constant 0 : index
    %c0_93 = arith.constant 0 : index
    %320 = vector.load %arg15[%319, %c0_92, %c0_93] : memref<8x8x128xbf16, #tpu.memory_space<vmem>>, vector<1x8x128xbf16>
    %321 = vector.shape_cast %320 : vector<1x8x128xbf16> to vector<8x128xbf16>
    %322 = arith.extf %321 : vector<8x128xbf16> to vector<8x128xf32>
    %323 = arith.truncf %318 : vector<8x32xf32> to vector<8x32xbf16>
    %cst_94 = arith.constant dense<0.000000e+00> : vector<8x128xf32>
    %324 = tpu.matmul %323, %238, %cst_94 {dimension_numbers = #tpu.dot_dimension_numbers<[1], [0], [0], [1], [0, 0, 1, 1], [], []>} : vector<8x32xbf16>, vector<32x128xbf16>, vector<8x128xf32> -> vector<8x128xf32>
    %325 = arith.addf %322, %324 : vector<8x128xf32>
    %326 = vector.extract_strided_slice %325 {offsets = [0, 0], sizes = [8, 96], strides = [1, 1]} : vector<8x128xf32> to vector<8x96xf32>
    %327 = arith.negf %326 : vector<8x96xf32>
    %328 = math.exp %327 : vector<8x96xf32>
    %cst_95 = arith.constant 1.000000e+00 : f32
    %329 = vector.broadcast %cst_95 : f32 to vector<8x96xf32>
    %330 = arith.addf %329, %328 : vector<8x96xf32>
    %331 = arith.divf %329, %330 : vector<8x96xf32>
    %332 = vector.extract_strided_slice %325 {offsets = [0, 96], sizes = [8, 32], strides = [1, 1]} : vector<8x128xf32> to vector<8x32xf32>
    %333 = math.tanh %332 : vector<8x32xf32>
    %334 = vector.extract_strided_slice %331 {offsets = [0, 32], sizes = [8, 32], strides = [1, 1]} : vector<8x96xf32> to vector<8x32xf32>
    %335 = arith.mulf %334, %315 : vector<8x32xf32>
    %336 = vector.extract_strided_slice %331 {offsets = [0, 0], sizes = [8, 32], strides = [1, 1]} : vector<8x96xf32> to vector<8x32xf32>
    %337 = arith.mulf %336, %333 : vector<8x32xf32>
    %338 = arith.addf %335, %337 : vector<8x32xf32>
    %339 = vector.extract_strided_slice %331 {offsets = [0, 64], sizes = [8, 32], strides = [1, 1]} : vector<8x96xf32> to vector<8x32xf32>
    %340 = math.tanh %338 : vector<8x32xf32>
    %341 = arith.mulf %339, %340 : vector<8x32xf32>
    %c4_i32_96 = arith.constant 4 : i32
    %342 = arith.index_cast %c4_i32_96 : i32 to index
    %c0_97 = arith.constant 0 : index
    %c0_98 = arith.constant 0 : index
    %343 = vector.load %arg15[%342, %c0_97, %c0_98] : memref<8x8x128xbf16, #tpu.memory_space<vmem>>, vector<1x8x128xbf16>
    %344 = vector.shape_cast %343 : vector<1x8x128xbf16> to vector<8x128xbf16>
    %345 = arith.extf %344 : vector<8x128xbf16> to vector<8x128xf32>
    %346 = arith.truncf %341 : vector<8x32xf32> to vector<8x32xbf16>
    %cst_99 = arith.constant dense<0.000000e+00> : vector<8x128xf32>
    %347 = tpu.matmul %346, %238, %cst_99 {dimension_numbers = #tpu.dot_dimension_numbers<[1], [0], [0], [1], [0, 0, 1, 1], [], []>} : vector<8x32xbf16>, vector<32x128xbf16>, vector<8x128xf32> -> vector<8x128xf32>
    %348 = arith.addf %345, %347 : vector<8x128xf32>
    %349 = vector.extract_strided_slice %348 {offsets = [0, 0], sizes = [8, 96], strides = [1, 1]} : vector<8x128xf32> to vector<8x96xf32>
    %350 = arith.negf %349 : vector<8x96xf32>
    %351 = math.exp %350 : vector<8x96xf32>
    %cst_100 = arith.constant 1.000000e+00 : f32
    %352 = vector.broadcast %cst_100 : f32 to vector<8x96xf32>
    %353 = arith.addf %352, %351 : vector<8x96xf32>
    %354 = arith.divf %352, %353 : vector<8x96xf32>
    %355 = vector.extract_strided_slice %348 {offsets = [0, 96], sizes = [8, 32], strides = [1, 1]} : vector<8x128xf32> to vector<8x32xf32>
    %356 = math.tanh %355 : vector<8x32xf32>
    %357 = vector.extract_strided_slice %354 {offsets = [0, 32], sizes = [8, 32], strides = [1, 1]} : vector<8x96xf32> to vector<8x32xf32>
    %358 = arith.mulf %357, %338 : vector<8x32xf32>
    %359 = vector.extract_strided_slice %354 {offsets = [0, 0], sizes = [8, 32], strides = [1, 1]} : vector<8x96xf32> to vector<8x32xf32>
    %360 = arith.mulf %359, %356 : vector<8x32xf32>
    %361 = arith.addf %358, %360 : vector<8x32xf32>
    %362 = vector.extract_strided_slice %354 {offsets = [0, 64], sizes = [8, 32], strides = [1, 1]} : vector<8x96xf32> to vector<8x32xf32>
    %363 = math.tanh %361 : vector<8x32xf32>
    %364 = arith.mulf %362, %363 : vector<8x32xf32>
    %c5_i32_101 = arith.constant 5 : i32
    %365 = arith.index_cast %c5_i32_101 : i32 to index
    %c0_102 = arith.constant 0 : index
    %c0_103 = arith.constant 0 : index
    %366 = vector.load %arg15[%365, %c0_102, %c0_103] : memref<8x8x128xbf16, #tpu.memory_space<vmem>>, vector<1x8x128xbf16>
    %367 = vector.shape_cast %366 : vector<1x8x128xbf16> to vector<8x128xbf16>
    %368 = arith.extf %367 : vector<8x128xbf16> to vector<8x128xf32>
    %369 = arith.truncf %364 : vector<8x32xf32> to vector<8x32xbf16>
    %cst_104 = arith.constant dense<0.000000e+00> : vector<8x128xf32>
    %370 = tpu.matmul %369, %238, %cst_104 {dimension_numbers = #tpu.dot_dimension_numbers<[1], [0], [0], [1], [0, 0, 1, 1], [], []>} : vector<8x32xbf16>, vector<32x128xbf16>, vector<8x128xf32> -> vector<8x128xf32>
    %371 = arith.addf %368, %370 : vector<8x128xf32>
    %372 = vector.extract_strided_slice %371 {offsets = [0, 0], sizes = [8, 96], strides = [1, 1]} : vector<8x128xf32> to vector<8x96xf32>
    %373 = arith.negf %372 : vector<8x96xf32>
    %374 = math.exp %373 : vector<8x96xf32>
    %cst_105 = arith.constant 1.000000e+00 : f32
    %375 = vector.broadcast %cst_105 : f32 to vector<8x96xf32>
    %376 = arith.addf %375, %374 : vector<8x96xf32>
    %377 = arith.divf %375, %376 : vector<8x96xf32>
    %378 = vector.extract_strided_slice %371 {offsets = [0, 96], sizes = [8, 32], strides = [1, 1]} : vector<8x128xf32> to vector<8x32xf32>
    %379 = math.tanh %378 : vector<8x32xf32>
    %380 = vector.extract_strided_slice %377 {offsets = [0, 32], sizes = [8, 32], strides = [1, 1]} : vector<8x96xf32> to vector<8x32xf32>
    %381 = arith.mulf %380, %361 : vector<8x32xf32>
    %382 = vector.extract_strided_slice %377 {offsets = [0, 0], sizes = [8, 32], strides = [1, 1]} : vector<8x96xf32> to vector<8x32xf32>
    %383 = arith.mulf %382, %379 : vector<8x32xf32>
    %384 = arith.addf %381, %383 : vector<8x32xf32>
    %385 = vector.extract_strided_slice %377 {offsets = [0, 64], sizes = [8, 32], strides = [1, 1]} : vector<8x96xf32> to vector<8x32xf32>
    %386 = math.tanh %384 : vector<8x32xf32>
    %387 = arith.mulf %385, %386 : vector<8x32xf32>
    %c6_i32_106 = arith.constant 6 : i32
    %388 = arith.index_cast %c6_i32_106 : i32 to index
    %c0_107 = arith.constant 0 : index
    %c0_108 = arith.constant 0 : index
    %389 = vector.load %arg15[%388, %c0_107, %c0_108] : memref<8x8x128xbf16, #tpu.memory_space<vmem>>, vector<1x8x128xbf16>
    %390 = vector.shape_cast %389 : vector<1x8x128xbf16> to vector<8x128xbf16>
    %391 = arith.extf %390 : vector<8x128xbf16> to vector<8x128xf32>
    %392 = arith.truncf %387 : vector<8x32xf32> to vector<8x32xbf16>
    %cst_109 = arith.constant dense<0.000000e+00> : vector<8x128xf32>
    %393 = tpu.matmul %392, %238, %cst_109 {dimension_numbers = #tpu.dot_dimension_numbers<[1], [0], [0], [1], [0, 0, 1, 1], [], []>} : vector<8x32xbf16>, vector<32x128xbf16>, vector<8x128xf32> -> vector<8x128xf32>
    %394 = arith.addf %391, %393 : vector<8x128xf32>
    %395 = vector.extract_strided_slice %394 {offsets = [0, 0], sizes = [8, 96], strides = [1, 1]} : vector<8x128xf32> to vector<8x96xf32>
    %396 = arith.negf %395 : vector<8x96xf32>
    %397 = math.exp %396 : vector<8x96xf32>
    %cst_110 = arith.constant 1.000000e+00 : f32
    %398 = vector.broadcast %cst_110 : f32 to vector<8x96xf32>
    %399 = arith.addf %398, %397 : vector<8x96xf32>
    %400 = arith.divf %398, %399 : vector<8x96xf32>
    %401 = vector.extract_strided_slice %394 {offsets = [0, 96], sizes = [8, 32], strides = [1, 1]} : vector<8x128xf32> to vector<8x32xf32>
    %402 = math.tanh %401 : vector<8x32xf32>
    %403 = vector.extract_strided_slice %400 {offsets = [0, 32], sizes = [8, 32], strides = [1, 1]} : vector<8x96xf32> to vector<8x32xf32>
    %404 = arith.mulf %403, %384 : vector<8x32xf32>
    %405 = vector.extract_strided_slice %400 {offsets = [0, 0], sizes = [8, 32], strides = [1, 1]} : vector<8x96xf32> to vector<8x32xf32>
    %406 = arith.mulf %405, %402 : vector<8x32xf32>
    %407 = arith.addf %404, %406 : vector<8x32xf32>
    %408 = vector.extract_strided_slice %400 {offsets = [0, 64], sizes = [8, 32], strides = [1, 1]} : vector<8x96xf32> to vector<8x32xf32>
    %409 = math.tanh %407 : vector<8x32xf32>
    %410 = arith.mulf %408, %409 : vector<8x32xf32>
    %c7_i32_111 = arith.constant 7 : i32
    %411 = arith.index_cast %c7_i32_111 : i32 to index
    %c0_112 = arith.constant 0 : index
    %c0_113 = arith.constant 0 : index
    %412 = vector.load %arg15[%411, %c0_112, %c0_113] : memref<8x8x128xbf16, #tpu.memory_space<vmem>>, vector<1x8x128xbf16>
    %413 = vector.shape_cast %412 : vector<1x8x128xbf16> to vector<8x128xbf16>
    %414 = arith.extf %413 : vector<8x128xbf16> to vector<8x128xf32>
    %415 = arith.truncf %410 : vector<8x32xf32> to vector<8x32xbf16>
    %cst_114 = arith.constant dense<0.000000e+00> : vector<8x128xf32>
    %416 = tpu.matmul %415, %238, %cst_114 {dimension_numbers = #tpu.dot_dimension_numbers<[1], [0], [0], [1], [0, 0, 1, 1], [], []>} : vector<8x32xbf16>, vector<32x128xbf16>, vector<8x128xf32> -> vector<8x128xf32>
    %417 = arith.addf %414, %416 : vector<8x128xf32>
    %418 = vector.extract_strided_slice %417 {offsets = [0, 0], sizes = [8, 96], strides = [1, 1]} : vector<8x128xf32> to vector<8x96xf32>
    %419 = arith.negf %418 : vector<8x96xf32>
    %420 = math.exp %419 : vector<8x96xf32>
    %cst_115 = arith.constant 1.000000e+00 : f32
    %421 = vector.broadcast %cst_115 : f32 to vector<8x96xf32>
    %422 = arith.addf %421, %420 : vector<8x96xf32>
    %423 = arith.divf %421, %422 : vector<8x96xf32>
    %424 = vector.extract_strided_slice %417 {offsets = [0, 96], sizes = [8, 32], strides = [1, 1]} : vector<8x128xf32> to vector<8x32xf32>
    %425 = math.tanh %424 : vector<8x32xf32>
    %426 = vector.extract_strided_slice %423 {offsets = [0, 32], sizes = [8, 32], strides = [1, 1]} : vector<8x96xf32> to vector<8x32xf32>
    %427 = arith.mulf %426, %407 : vector<8x32xf32>
    %428 = vector.extract_strided_slice %423 {offsets = [0, 0], sizes = [8, 32], strides = [1, 1]} : vector<8x96xf32> to vector<8x32xf32>
    %429 = arith.mulf %428, %425 : vector<8x32xf32>
    %430 = arith.addf %427, %429 : vector<8x32xf32>
    %431 = vector.extract_strided_slice %423 {offsets = [0, 64], sizes = [8, 32], strides = [1, 1]} : vector<8x96xf32> to vector<8x32xf32>
    %432 = math.tanh %430 : vector<8x32xf32>
    %433 = arith.mulf %431, %432 : vector<8x32xf32>
    %c8_i32_116 = arith.constant 8 : i32
    %434 = arith.truncf %433 : vector<8x32xf32> to vector<8x32xbf16>
    %c0_117 = arith.constant 0 : index
    %c0_118 = arith.constant 0 : index
    %435 = vector.load %arg8[%c0_117, %c0_118] : memref<32x128xbf16, #tpu.memory_space<vmem>>, vector<32x128xbf16>
    %cst_119 = arith.constant dense<0.000000e+00> : vector<8x128xf32>
    %436 = tpu.matmul %434, %435, %cst_119 {dimension_numbers = #tpu.dot_dimension_numbers<[1], [0], [0], [1], [0, 0, 1, 1], [], []>} : vector<8x32xbf16>, vector<32x128xbf16>, vector<8x128xf32> -> vector<8x128xf32>
    %c0_120 = arith.constant 0 : index
    %c0_121 = arith.constant 0 : index
    %437 = vector.load %arg9[%c0_120, %c0_121] : memref<1x128xf32, #tpu.memory_space<vmem>>, vector<1x128xf32>
    %438 = vector.broadcast %437 : vector<1x128xf32> to vector<8x128xf32>
    %439 = arith.addf %436, %438 : vector<8x128xf32>
    %cst_122 = arith.constant 0.000000e+00 : f32
    %440 = vector.broadcast %cst_122 : f32 to vector<8x128xf32>
    %441 = arith.maximumf %439, %440 : vector<8x128xf32>
    %442 = arith.truncf %441 : vector<8x128xf32> to vector<8x128xbf16>
    %c0_123 = arith.constant 0 : index
    %c0_124 = arith.constant 0 : index
    %443 = vector.load %arg10[%c0_123, %c0_124] : memref<128x128xbf16, #tpu.memory_space<vmem>>, vector<128x128xbf16>
    %cst_125 = arith.constant dense<0.000000e+00> : vector<8x128xf32>
    %444 = tpu.matmul %442, %443, %cst_125 {dimension_numbers = #tpu.dot_dimension_numbers<[1], [0], [0], [1], [0, 0, 1, 1], [], []>} : vector<8x128xbf16>, vector<128x128xbf16>, vector<8x128xf32> -> vector<8x128xf32>
    %c0_126 = arith.constant 0 : index
    %c0_127 = arith.constant 0 : index
    %445 = vector.load %arg11[%c0_126, %c0_127] : memref<1x128xf32, #tpu.memory_space<vmem>>, vector<1x128xf32>
    %446 = vector.broadcast %445 : vector<1x128xf32> to vector<8x128xf32>
    %447 = arith.addf %444, %446 : vector<8x128xf32>
    %cst_128 = arith.constant 0.000000e+00 : f32
    %448 = vector.broadcast %cst_128 : f32 to vector<8x128xf32>
    %449 = arith.maximumf %447, %448 : vector<8x128xf32>
    %450 = arith.truncf %449 : vector<8x128xf32> to vector<8x128xbf16>
    %c0_129 = arith.constant 0 : index
    %c0_130 = arith.constant 0 : index
    %451 = vector.load %arg12[%c0_129, %c0_130] : memref<128x128xbf16, #tpu.memory_space<vmem>>, vector<128x128xbf16>
    %cst_131 = arith.constant dense<0.000000e+00> : vector<8x128xf32>
    %452 = tpu.matmul %450, %451, %cst_131 {dimension_numbers = #tpu.dot_dimension_numbers<[1], [0], [0], [1], [0, 0, 1, 1], [], []>} : vector<8x128xbf16>, vector<128x128xbf16>, vector<8x128xf32> -> vector<8x128xf32>
    %c0_132 = arith.constant 0 : index
    %c0_133 = arith.constant 0 : index
    %453 = vector.load %arg13[%c0_132, %c0_133] : memref<1x128xf32, #tpu.memory_space<vmem>>, vector<1x128xf32>
    %454 = vector.broadcast %453 : vector<1x128xf32> to vector<8x128xf32>
    %455 = arith.addf %452, %454 : vector<8x128xf32>
    %c0_134 = arith.constant 0 : index
    %c0_135 = arith.constant 0 : index
    %456 = vector.load %arg14[%c0_134, %c0_135] : memref<8x128xf32, #tpu.memory_space<vmem>>, vector<8x128xf32>
    tpu.vector_store %arg14[%c0_134, %c0_135], %455 {strides = array<i32>} : memref<8x128xf32, #tpu.memory_space<vmem>>, vector<8x128xf32>,
    return
  }
  func.func @transform_0(%arg0: i32) -> (i32, i32, i32) {
    %c0_i32 = arith.constant 0 : i32
    %c0_i32_0 = arith.constant 0 : i32
    %c0_i32_1 = arith.constant 0 : i32
    return %c0_i32, %arg0, %c0_i32_0 : i32, i32, i32
  }
  func.func @transform_1(%arg0: i32) -> (i32, i32) {
    %c0_i32 = arith.constant 0 : i32
    %c0_i32_0 = arith.constant 0 : i32
    %c0_i32_1 = arith.constant 0 : i32
    return %c0_i32, %c0_i32_0 : i32, i32
  }
  func.func @transform_2(%arg0: i32) -> (i32, i32) {
    %c0_i32 = arith.constant 0 : i32
    %c0_i32_0 = arith.constant 0 : i32
    %c0_i32_1 = arith.constant 0 : i32
    return %c0_i32, %c0_i32_0 : i32, i32
  }
  func.func @transform_3(%arg0: i32) -> (i32, i32) {
    %c0_i32 = arith.constant 0 : i32
    %c0_i32_0 = arith.constant 0 : i32
    %c0_i32_1 = arith.constant 0 : i32
    return %c0_i32, %c0_i32_0 : i32, i32
  }
  func.func @transform_4(%arg0: i32) -> (i32, i32) {
    %c0_i32 = arith.constant 0 : i32
    %c0_i32_0 = arith.constant 0 : i32
    %c0_i32_1 = arith.constant 0 : i32
    return %c0_i32, %c0_i32_0 : i32, i32
  }
  func.func @transform_5(%arg0: i32) -> (i32, i32) {
    %c0_i32 = arith.constant 0 : i32
    %c0_i32_0 = arith.constant 0 : i32
    %c0_i32_1 = arith.constant 0 : i32
    return %c0_i32, %c0_i32_0 : i32, i32
  }
  func.func @transform_6(%arg0: i32) -> (i32, i32) {
    %c0_i32 = arith.constant 0 : i32
    %c0_i32_0 = arith.constant 0 : i32
    %c0_i32_1 = arith.constant 0 : i32
    return %c0_i32, %c0_i32_0 : i32, i32
  }
  func.func @transform_7(%arg0: i32) -> (i32, i32) {
    %c0_i32 = arith.constant 0 : i32
    %c0_i32_0 = arith.constant 0 : i32
    %c0_i32_1 = arith.constant 0 : i32
    return %c0_i32, %c0_i32_0 : i32, i32
  }
  func.func @transform_8(%arg0: i32) -> (i32, i32) {
    %c0_i32 = arith.constant 0 : i32
    %c0_i32_0 = arith.constant 0 : i32
    %c0_i32_1 = arith.constant 0 : i32
    return %c0_i32, %c0_i32_0 : i32, i32
  }
  func.func @transform_9(%arg0: i32) -> (i32, i32) {
    %c0_i32 = arith.constant 0 : i32
    %c0_i32_0 = arith.constant 0 : i32
    %c0_i32_1 = arith.constant 0 : i32
    return %c0_i32, %c0_i32_0 : i32, i32
  }
  func.func @transform_10(%arg0: i32) -> (i32, i32) {
    %c0_i32 = arith.constant 0 : i32
    %c0_i32_0 = arith.constant 0 : i32
    %c0_i32_1 = arith.constant 0 : i32
    return %c0_i32, %c0_i32_0 : i32, i32
  }
  func.func @transform_11(%arg0: i32) -> (i32, i32) {
    %c0_i32 = arith.constant 0 : i32
    %c0_i32_0 = arith.constant 0 : i32
    %c0_i32_1 = arith.constant 0 : i32
    return %c0_i32, %c0_i32_0 : i32, i32
  }
  func.func @transform_12(%arg0: i32) -> (i32, i32) {
    %c0_i32 = arith.constant 0 : i32
    %c0_i32_0 = arith.constant 0 : i32
    %c0_i32_1 = arith.constant 0 : i32
    return %c0_i32, %c0_i32_0 : i32, i32
  }
  func.func @transform_13(%arg0: i32) -> (i32, i32) {
    %c0_i32 = arith.constant 0 : i32
    %c0_i32_0 = arith.constant 0 : i32
    return %arg0, %c0_i32 : i32, i32
  }
}

</mosaic_0001>

<bundles_post_ra>
// kernel: deep_lstm_forward.1
= control target key start
LH: loop header
LB: loop body
LE: loop exit
PB: predicated region body
PF: predicated region fallthrough
CT: control target
= control target key end

     0   :  { %vm89_vm0 = vcmask 130048   ;;  %v1890_v4 = vmov 0   ;;  %s1891_s16 = smov 32   ;;  %vm161_vm5 = vcmask 261120   ;;  %s2287_s1 = inlined_call_operand.vmem [shape: bf16[16,128], index: 1, kind: input, shape index: {}]   ;;  %s2288_s0 = inlined_call_operand.vmem [shape: bf16[8,8,16], index: 0, kind: input, shape index: {}]   ;;  %s2289_s2 = inlined_call_operand.vmem [shape: bf16[32,128], index: 2, kind: input, shape index: {}]   ;;  %s2290_s3 = inlined_call_operand.vmem [shape: f32[1,128], index: 3, kind: input, shape index: {}]   ;;  %s2291_s4 = inlined_call_operand.vmem [shape: bf16[32,128], index: 4, kind: input, shape index: {}]   ;;  %s2292_s6 = inlined_call_operand.vmem [shape: f32[1,128], index: 6, kind: input, shape index: {}]   ;;  %s2293_s5 = inlined_call_operand.vmem [shape: bf16[32,128], index: 5, kind: input, shape index: {}]   ;;  %s2294_s7 = inlined_call_operand.vmem [shape: bf16[32,128], index: 7, kind: input, shape index: {}]   ;;  %s2295_s8 = inlined_call_operand.vmem [shape: f32[1,128], index: 8, kind: input, shape index: {}]   ;;  %s2296_s9 = inlined_call_operand.vmem [shape: bf16[128,128], index: 9, kind: input, shape index: {}]   ;;  %s2297_s10 = inlined_call_operand.vmem [shape: f32[1,128], index: 10, kind: input, shape index: {}]   ;;  %s2298_s11 = inlined_call_operand.vmem [shape: bf16[128,128], index: 11, kind: input, shape index: {}]   ;;  %s2299_s12 = inlined_call_operand.vmem [shape: f32[1,128], index: 12, kind: input, shape index: {}]   ;;  %s2300_s13 = inlined_call_operand.vmem [shape: f32[8,128], index: 13, kind: output, shape index: {}]  }
   0x1   :  { %v1681_v0 = vld [vmem:[%s2287_s1] sm:$0xff]  ;;  %v1969_v1 = vld [vmem:[%s2289_s2 + $0x8] sm:$0xff] }
   0x2   :  { %v1675_v2 = vld [vmem:[%s2288_s0] sm:$0xff]  ;;  %109 = vmatpush.bf16.msra.mxu0 %v1681_v0  ;;  %171 = vmatpush.bf16.msra.mxu2 %v1969_v1 }
   0x3   :  { %v1978_v3 = vld [vmem:[%s2289_s2] sm:$0xff]  ;;  %307 = vmatpush.bf16.msra.mxu3 %v1969_v1  ;;  %375 = vmatpush.bf16.msra.mxu1 %v1969_v1 }
   0x4   :  { %v1998_v6 = vld [vmem:[%s2290_s3] ss:$0 sm:$0xff]  ;;  %s1892_s3 = smov 64  }
   0x5   :  { %1524 = vmatmul.msk.bf16.vlgmr.msra.gmra.mxu0 %vm89_vm0, %v1675_v2  ;;  %v1676_v2 = vld [vmem:[%s2288_s0 + $0x8] sm:$0xff] }
   0x6   :  { %172 = vmatpush.bf16.msra.mxu2 %v1978_v3 }
   0x7   :  { %308 = vmatpush.bf16.msra.mxu3 %v1978_v3  ;;  %376 = vmatpush.bf16.msra.mxu1 %v1978_v3 }
   0x9   :  { %173 = vmatmul.bf16.vlgmr.msra.gmra.mxu2 %v1890_v4 }
   0xa   :  { %239 = vmatpush.bf16.msrb.mxu2 %v1969_v1 }
   0xb   :  { %511 = vmatpush.bf16.msrb.mxu3 %v1969_v1  ;;  %579 = vmatpush.bf16.msrb.mxu1 %v1969_v1 }
   0xe   :  { %240 = vmatpush.bf16.msrb.mxu2 %v1978_v3 }
   0xf   :  { %512 = vmatpush.bf16.msrb.mxu3 %v1978_v3  ;;  %580 = vmatpush.bf16.msrb.mxu1 %v1978_v3 }
  0x12   :  { %443 = vmatpush.bf16.msra.mxu2 %v1969_v1 }
  0x15   :  { %1525 = vmatmul.msk.bf16.gmra.mxu0 %vm89_vm0, %v1676_v2 }
  0x16   :  { %444 = vmatpush.bf16.msra.mxu2 %v1978_v3 }
  0x82   :  { %v111_v5 = vpop.f32.mrf.mxu0 }
  0x83   :  { %v112_v8 = vadd.f32 %v1998_v6, %v111_v5 }
  0x8a   :  { %v113_v7 = vpop.f32.mrf.mxu0 }
  0x8b   :  { %v114_v9 = vadd.f32 %v1998_v6, %v113_v7 }
  0x8c   :  { %v174_v10 = vpop.f32.mrf.mxu2 }
  0x8d   :  { %v1711_v11 = vpack.c.bf16 %v114_v9, %v112_v8 }
  0x8f   :  { %1712 = vst [vmem:[#allocation2] sm:$0xff] %v1711_v11  }
  0x94   :  { %v176_v12 = vpop.f32.mrf.mxu2 }
  0x96   :  { %v147_v13 = vld [vmem:[#allocation2] sm:$0xff]  }
  0x97   :  { %v148_v14 = vunpack.c.l.bf16 %v147_v13  ;;  %v225_v42 = vunpack.c.h.bf16 %v147_v13 }
  0x99   :  { %v178_v15 = vadd.f32 %v174_v10, %v148_v14  ;;  %v116_v10 = vpop.f32.mrf.mxu0 }
  0x9a   :  { %v117_v11 = vadd.f32 %v1998_v6, %v116_v10 }
  0x9b   :  { %1762 = vtanh.f32 %v178_v15  ;;  %v1536_v17 = vmul.f32 -1.442695, %v178_v15 }
  0x9d   :  { %1764 = vpow2.f32 %v1536_v17 }
  0xa1   :  { %v1763_v16 = vpop.eup %1762  ;;  %v118_v12 = vpop.f32.mrf.mxu0 }
  0xa2   :  { %201 = vrot.lane.b32.xlu0 %v1763_v16, %s1891_s16  ;;  %v119_v13 = vadd.f32 %v1998_v6, %v118_v12 }
  0xa3   :  { %v1765_v18 = vpop.eup %1764 }
  0xa4   :  { %v182_v19 = vadd.f32 1.0, %v1765_v18  ;;  %v1716_v14 = vpack.c.bf16 %v119_v13, %v117_v11  ;;  %v1677_v11 = vld [vmem:[%s2288_s0 + $0x10] sm:$0xff] }
  0xa5   :  { %1526 = vmatmul.msk.bf16.gmra.mxu0 %vm89_vm0, %v1677_v11 }
  0xa6   :  { %1766 = vrcp.f32 %v182_v19  ;;  %v194_v25 = vand.u32 2147483648, %v182_v19  ;;  %vm188_vm2 = vweird.f32 %v182_v19  ;;  %v192_v26 = vand.u32 2147483647, %v182_v19  ;;  %1748 = vst [vmem:[#allocation2 + $0x8] sm:$0xff] %v1716_v14  }
  0xa8   :  { %v195_v28 = vor.u32 1.1754944e-38, %v194_v25  ;;  %vm193_vm4 = vcmp.eq.f32.partialorder %v192_v26, 8.507059e+37 }
  0xac   :  { %v1767_v20 = vpop.eup %1766 }
  0xad   :  { %v184_v21 = vmul.f32 %v1767_v20, %v182_v19  ;;  %vm189_vm1 = vweird.f32 %v1767_v20  ;;  %v292_v16 = vld [vmem:[#allocation2 + $0x8] sm:$0xff]  }
  0xae   :  { %vm190_vm3 = vmor %vm188_vm2, %vm189_vm1  ;;  %v293_v17 = vunpack.c.l.bf16 %v292_v16 }
  0xaf   :  { %v185_v22 = vsub.f32 1.0, %v184_v21 }
  0xb1   :  { %v186_v23 = vmul.f32 %v1767_v20, %v185_v22 }
  0xb3   :  { %v187_v24 = vadd.f32 %v1767_v20, %v186_v23 }
  0xb5   :  { %v191_v27 = vsel %vm190_vm3, %v1767_v20, %v187_v24 }
  0xb6   :  { %v196_v30 = vsel %vm193_vm4, %v195_v28, %v191_v27 }
  0xb7   :  { %v199_v32 = vmul.f32 0.0, %v196_v30 }
 0x114   :  { %v202_v29 = vpop.permute.xlu0 %201 }
 0x115   :  { %v204_v31 = vmul.f32 %v202_v29, %v196_v30 }
 0x117   :  { %206 = vrot.lane.b32.xlu0 %v204_v31, %s1891_s16 }
 0x189   :  { %v207_v33 = vpop.permute.xlu0 %206 }
 0x18a   :  { %v209_v34 = vadd.f32 %v207_v33, %v199_v32 }
 0x18c   :  { %1768 = vtanh.f32 %v209_v34 }
 0x192   :  { %v1769_v35 = vpop.eup %1768 }
 0x193   :  { %212 = vrot.lane.b32.xlu1 %v1769_v35, %s1891_s16 }
 0x205   :  { %v213_v36 = vpop.permute.xlu1 %212 }
 0x206   :  { %v215_v37 = vmul.f32 %v213_v36, %v196_v30 }
 0x208   :  { %v2005_v38 = vpack.c.bf16 %v215_v37, %v215_v37 }
 0x20a   :  { %v226_v39 = vunpack.c.l.b16 %v2005_v38 }
 0x20c   :  { %v227_v40 = vpack.c.b16 %v226_v39, %v226_v39 }
 0x20e   :  { %228 = vrot.lane.b32.xlu1 %v227_v40, %s1892_s3 }
 0x280   :  { %v229_v41 = vpop.permute.xlu1 %228 }
 0x281   :  { %1537 = vmatmul.msk.bf16.vlgmr.msrb.gmra.mxu2 %vm161_vm5, %v229_v41 }
 0x282   :  { %647 = vmatpush.bf16.msrb.mxu2 %v1969_v1 }
 0x286   :  { %648 = vmatpush.bf16.msrb.mxu2 %v1978_v3 }
 0x304   :  { %v242_v43 = vpop.f32.mrf.mxu2 }
 0x305   :  { %v246_v44 = vadd.f32 %v242_v43, %v225_v42 }
 0x307   :  { %1770 = vtanh.f32 %v246_v44  ;;  %v1538_v47 = vmul.f32 -1.442695, %v246_v44 }
 0x309   :  { %1772 = vpow2.f32 %v1538_v47 }
 0x30c   :  { %v244_v45 = vpop.f32.mrf.mxu2 }
 0x30d   :  { %v1771_v46 = vpop.eup %1770 }
 0x30e   :  { %269 = vrot.lane.b32.xlu2 %v1771_v46, %s1891_s16 }
 0x30f   :  { %v1773_v48 = vpop.eup %1772 }
 0x310   :  { %v250_v49 = vadd.f32 1.0, %v1773_v48  ;;  %v361_v48 = vunpack.c.h.bf16 %v292_v16 }
 0x312   :  { %1774 = vrcp.f32 %v250_v49  ;;  %v262_v55 = vand.u32 2147483648, %v250_v49  ;;  %vm256_vm7 = vweird.f32 %v250_v49  ;;  %v260_v56 = vand.u32 2147483647, %v250_v49 }
 0x314   :  { %v263_v58 = vor.u32 1.1754944e-38, %v262_v55  ;;  %vm261_vm9 = vcmp.eq.f32.partialorder %v260_v56, 8.507059e+37 }
 0x318   :  { %v1775_v50 = vpop.eup %1774 }
 0x319   :  { %v252_v51 = vmul.f32 %v1775_v50, %v250_v49  ;;  %vm257_vm6 = vweird.f32 %v1775_v50 }
 0x31a   :  { %vm258_vm8 = vmor %vm256_vm7, %vm257_vm6 }
 0x31b   :  { %v253_v52 = vsub.f32 1.0, %v252_v51 }
 0x31d   :  { %v254_v53 = vmul.f32 %v1775_v50, %v253_v52 }
 0x31f   :  { %v255_v54 = vadd.f32 %v1775_v50, %v254_v53 }
 0x321   :  { %v259_v57 = vsel %vm258_vm8, %v1775_v50, %v255_v54 }
 0x322   :  { %v264_v60 = vsel %vm261_vm9, %v263_v58, %v259_v57 }
 0x323   :  { %v267_v62 = vmul.f32 %v264_v60, %v209_v34 }
 0x368   :  { %v270_v59 = vpop.permute.xlu2 %269 }
 0x369   :  { %v272_v61 = vmul.f32 %v270_v59, %v264_v60 }
 0x36b   :  { %274 = vrot.lane.b32.xlu2 %v272_v61, %s1891_s16 }
 0x3c5   :  { %v275_v63 = vpop.permute.xlu2 %274 }
 0x3c6   :  { %v277_v0 = vadd.f32 %v275_v63, %v267_v62 }
 0x3c8   :  { %1776 = vtanh.f32 %v277_v0 }
 0x3ce   :  { %v1777_v1 = vpop.eup %1776 }
 0x3cf   :  { %280 = vrot.lane.b32.xlu0 %v1777_v1, %s1891_s16 }
 0x441   :  { %v281_v3 = vpop.permute.xlu0 %280 }
 0x442   :  { %v283_v5 = vmul.f32 %v281_v3, %v264_v60 }
 0x444   :  { %v2019_v7 = vpack.c.bf16 %v283_v5, %v283_v5 }
 0x446   :  { %v294_v8 = vunpack.c.l.b16 %v2019_v7 }
 0x448   :  { %v295_v9 = vpack.c.b16 %v294_v8, %v294_v8 }
 0x44a   :  { %296 = vrot.lane.b32.xlu1 %v295_v9, %s1892_s3 }
 0x4bc   :  { %v297_v15 = vpop.permute.xlu1 %296 }
 0x4bd   :  { %1539 = vmatmul.msk.bf16.vlgmr.msra.gmra.mxu3 %vm161_vm5, %v297_v15 }
 0x540   :  { %v310_v18 = vpop.f32.mrf.mxu3 }
 0x541   :  { %v314_v19 = vadd.f32 %v310_v18, %v293_v17  ;;  %v121_v17 = vpop.f32.mrf.mxu0 }
 0x542   :  { %v122_v18 = vadd.f32 %v1998_v6, %v121_v17  ;;  %v1688_v17 = vld [vmem:[%s2291_s4] sm:$0xff] }
 0x543   :  { %1778 = vtanh.f32 %v314_v19  ;;  %v1540_v22 = vmul.f32 -1.442695, %v314_v19 }
 0x545   :  { %1780 = vpow2.f32 %v1540_v22 }
 0x548   :  { %v312_v20 = vpop.f32.mrf.mxu3 }
 0x549   :  { %v1779_v21 = vpop.eup %1778  ;;  %v123_v19 = vpop.f32.mrf.mxu0 }
 0x54a   :  { %337 = vrot.lane.b32.xlu2 %v1779_v21, %s1891_s16  ;;  %v124_v20 = vadd.f32 %v1998_v6, %v123_v19 }
 0x54b   :  { %v1781_v23 = vpop.eup %1780 }
 0x54c   :  { %v318_v24 = vadd.f32 1.0, %v1781_v23  ;;  %v1721_v21 = vpack.c.bf16 %v124_v20, %v122_v18 }
 0x54e   :  { %1782 = vrcp.f32 %v318_v24  ;;  %v330_v30 = vand.u32 2147483648, %v318_v24  ;;  %vm324_vm11 = vweird.f32 %v318_v24  ;;  %v328_v31 = vand.u32 2147483647, %v318_v24  ;;  %1749 = vst [vmem:[#allocation2 + $0x10] sm:$0xff] %v1721_v21  }
 0x550   :  { %v331_v33 = vor.u32 1.1754944e-38, %v330_v30  ;;  %vm329_vm13 = vcmp.eq.f32.partialorder %v328_v31, 8.507059e+37 }
 0x554   :  { %v1783_v25 = vpop.eup %1782 }
 0x555   :  { %v320_v26 = vmul.f32 %v1783_v25, %v318_v24  ;;  %vm325_vm10 = vweird.f32 %v1783_v25  ;;  %v428_v23 = vld [vmem:[#allocation2 + $0x10] sm:$0xff]  }
 0x556   :  { %vm326_vm12 = vmor %vm324_vm11, %vm325_vm10  ;;  %v429_v24 = vunpack.c.l.bf16 %v428_v23 }
 0x557   :  { %v321_v27 = vsub.f32 1.0, %v320_v26 }
 0x559   :  { %v322_v28 = vmul.f32 %v1783_v25, %v321_v27 }
 0x55b   :  { %v323_v29 = vadd.f32 %v1783_v25, %v322_v28 }
 0x55d   :  { %v327_v32 = vsel %vm326_vm12, %v1783_v25, %v323_v29  ;;  %vm221_vm12 = vcmask 257024  }
 0x55e   :  { %v332_v35 = vsel %vm329_vm13, %v331_v33, %v327_v32 }
 0x55f   :  { %v335_v37 = vmul.f32 %v332_v35, %v277_v0 }
 0x5a4   :  { %v338_v34 = vpop.permute.xlu2 %337 }
 0x5a5   :  { %v340_v36 = vmul.f32 %v338_v34, %v332_v35 }
 0x5a7   :  { %342 = vrot.lane.b32.xlu0 %v340_v36, %s1891_s16 }
 0x619   :  { %v343_v39 = vpop.permute.xlu0 %342 }
 0x61a   :  { %v345_v40 = vadd.f32 %v343_v39, %v335_v37 }
 0x61c   :  { %1784 = vtanh.f32 %v345_v40 }
 0x622   :  { %v1785_v41 = vpop.eup %1784 }
 0x623   :  { %348 = vrot.lane.b32.xlu1 %v1785_v41, %s1891_s16 }
 0x695   :  { %v349_v42 = vpop.permute.xlu1 %348 }
 0x696   :  { %v351_v43 = vmul.f32 %v349_v42, %v332_v35 }
 0x698   :  { %v2029_v44 = vpack.c.bf16 %v351_v43, %v351_v43 }
 0x69a   :  { %v362_v45 = vunpack.c.l.b16 %v2029_v44 }
 0x69c   :  { %v363_v46 = vpack.c.b16 %v362_v45, %v362_v45 }
 0x69e   :  { %364 = vrot.lane.b32.xlu2 %v363_v46, %s1892_s3 }
 0x6f8   :  { %v365_v47 = vpop.permute.xlu2 %364 }
 0x6f9   :  { %1541 = vmatmul.msk.bf16.vlgmr.msra.gmra.mxu1 %vm161_vm5, %v365_v47 }
 0x776   :  { %v378_v49 = vpop.f32.mrf.mxu1 }
 0x777   :  { %v382_v50 = vadd.f32 %v378_v49, %v361_v48 }
 0x779   :  { %1786 = vtanh.f32 %v382_v50  ;;  %v1542_v53 = vmul.f32 -1.442695, %v382_v50 }
 0x77b   :  { %1788 = vpow2.f32 %v1542_v53 }
 0x77e   :  { %v380_v51 = vpop.f32.mrf.mxu1 }
 0x77f   :  { %v1787_v52 = vpop.eup %1786 }
 0x780   :  { %405 = vrot.lane.b32.xlu0 %v1787_v52, %s1891_s16 }
 0x781   :  { %v1789_v54 = vpop.eup %1788 }
 0x782   :  { %v386_v55 = vadd.f32 1.0, %v1789_v54 }
 0x784   :  { %1790 = vrcp.f32 %v386_v55  ;;  %v398_v61 = vand.u32 2147483648, %v386_v55  ;;  %vm392_vm15 = vweird.f32 %v386_v55  ;;  %v396_v62 = vand.u32 2147483647, %v386_v55 }
 0x786   :  { %v399_v0 = vor.u32 1.1754944e-38, %v398_v61  ;;  %vm397_vm2 = vcmp.eq.f32.partialorder %v396_v62, 8.507059e+37 }
 0x78a   :  { %v1791_v56 = vpop.eup %1790 }
 0x78b   :  { %v388_v57 = vmul.f32 %v1791_v56, %v386_v55  ;;  %vm393_vm14 = vweird.f32 %v1791_v56 }
 0x78c   :  { %vm394_vm1 = vmor %vm392_vm15, %vm393_vm14 }
 0x78d   :  { %v389_v58 = vsub.f32 1.0, %v388_v57 }
 0x78f   :  { %v390_v59 = vmul.f32 %v1791_v56, %v389_v58 }
 0x791   :  { %v391_v60 = vadd.f32 %v1791_v56, %v390_v59 }
 0x793   :  { %v395_v63 = vsel %vm394_vm1, %v1791_v56, %v391_v60  ;;  %v497_v56 = vunpack.c.h.bf16 %v428_v23 }
 0x794   :  { %v400_v2 = vsel %vm397_vm2, %v399_v0, %v395_v63 }
 0x795   :  { %v403_v5 = vmul.f32 %v400_v2, %v345_v40 }
 0x7f2   :  { %v406_v1 = vpop.permute.xlu0 %405 }
 0x7f3   :  { %v408_v3 = vmul.f32 %v406_v1, %v400_v2 }
 0x7f5   :  { %410 = vrot.lane.b32.xlu1 %v408_v3, %s1891_s16 }
 0x867   :  { %v411_v8 = vpop.permute.xlu1 %410 }
 0x868   :  { %v413_v9 = vadd.f32 %v411_v8, %v403_v5 }
 0x86a   :  { %1792 = vtanh.f32 %v413_v9 }
 0x870   :  { %v1793_v10 = vpop.eup %1792 }
 0x871   :  { %416 = vrot.lane.b32.xlu2 %v1793_v10, %s1891_s16 }
 0x8cb   :  { %v417_v12 = vpop.permute.xlu2 %416 }
 0x8cc   :  { %v419_v13 = vmul.f32 %v417_v12, %v400_v2 }
 0x8ce   :  { %v2041_v14 = vpack.c.bf16 %v419_v13, %v419_v13 }
 0x8d0   :  { %v430_v15 = vunpack.c.l.b16 %v2041_v14 }
 0x8d2   :  { %v431_v16 = vpack.c.b16 %v430_v15, %v430_v15 }
 0x8d4   :  { %432 = vrot.lane.b32.xlu0 %v431_v16, %s1892_s3  ;;  %v1689_v16 = vld [vmem:[%s2291_s4 + $0x8] sm:$0xff] }
 0x8d5   :  { %769 = vmatpush.bf16.msra.mxu3 %v1689_v16 }
 0x8d9   :  { %770 = vmatpush.bf16.msra.mxu3 %v1688_v17 }
 0x946   :  { %v433_v22 = vpop.permute.xlu0 %432 }
 0x947   :  { %1543 = vmatmul.msk.bf16.vlgmr.msra.gmra.mxu2 %vm161_vm5, %v433_v22 }
 0x9ca   :  { %v446_v25 = vpop.f32.mrf.mxu2 }
 0x9cb   :  { %v450_v26 = vadd.f32 %v446_v25, %v429_v24 }
 0x9cd   :  { %1794 = vtanh.f32 %v450_v26  ;;  %v1544_v29 = vmul.f32 -1.442695, %v450_v26 }
 0x9cf   :  { %1796 = vpow2.f32 %v1544_v29 }
 0x9d2   :  { %v448_v27 = vpop.f32.mrf.mxu2 }
 0x9d3   :  { %v1795_v28 = vpop.eup %1794  ;;  %v1678_v27 = vld [vmem:[%s2288_s0 + $0x18] sm:$0xff] }
 0x9d4   :  { %473 = vrot.lane.b32.xlu1 %v1795_v28, %s1891_s16  ;;  %1527 = vmatmul.msk.bf16.gmra.mxu0 %vm89_vm0, %v1678_v27 }
 0x9d5   :  { %v1797_v30 = vpop.eup %1796 }
 0x9d6   :  { %v454_v31 = vadd.f32 1.0, %v1797_v30  ;;  %v2086_v30 = vld [vmem:[%s2292_s6] ss:$0 sm:$0xff] }
 0x9d8   :  { %1798 = vrcp.f32 %v454_v31  ;;  %v466_v37 = vand.u32 2147483648, %v454_v31  ;;  %vm460_vm4 = vweird.f32 %v454_v31  ;;  %v464_v39 = vand.u32 2147483647, %v454_v31 }
 0x9da   :  { %v467_v41 = vor.u32 1.1754944e-38, %v466_v37  ;;  %vm465_vm7 = vcmp.eq.f32.partialorder %v464_v39, 8.507059e+37 }
 0x9de   :  { %v1799_v32 = vpop.eup %1798 }
 0x9df   :  { %v456_v33 = vmul.f32 %v1799_v32, %v454_v31  ;;  %vm461_vm3 = vweird.f32 %v1799_v32 }
 0x9e0   :  { %vm462_vm6 = vmor %vm460_vm4, %vm461_vm3 }
 0x9e1   :  { %v457_v34 = vsub.f32 1.0, %v456_v33 }
 0x9e3   :  { %v458_v35 = vmul.f32 %v1799_v32, %v457_v34 }
 0x9e5   :  { %v459_v36 = vadd.f32 %v1799_v32, %v458_v35  ;;  %v2093_v35 = vld [vmem:[%s2293_s5 + $0x8] sm:$0xff] }
 0x9e6   :  { %828 = vmatpush.bf16.msra.mxu1 %v2093_v35  ;;  %888 = vmatpush.bf16.msra.mxu2 %v2093_v35 }
 0x9e7   :  { %v463_v40 = vsel %vm462_vm6, %v1799_v32, %v459_v36  ;;  %v2099_v36 = vld [vmem:[%s2293_s5] sm:$0xff]  ;;  %948 = vmatpush.bf16.msrb.mxu0 %v2093_v35 }
 0x9e8   :  { %v468_v43 = vsel %vm465_vm7, %v467_v41, %v463_v40 }
 0x9e9   :  { %v471_v46 = vmul.f32 %v468_v43, %v413_v9 }
 0x9ea   :  { %829 = vmatpush.bf16.msra.mxu1 %v2099_v36  ;;  %889 = vmatpush.bf16.msra.mxu2 %v2099_v36 }
 0x9eb   :  { %949 = vmatpush.bf16.msrb.mxu0 %v2099_v36 }
 0x9ef   :  { %1128 = vmatpush.bf16.msra.mxu0 %v2093_v35 }
 0x9f3   :  { %1129 = vmatpush.bf16.msra.mxu0 %v2099_v36 }
 0xa46   :  { %v474_v42 = vpop.permute.xlu1 %473 }
 0xa47   :  { %v476_v45 = vmul.f32 %v474_v42, %v468_v43 }
 0xa49   :  { %478 = vrot.lane.b32.xlu2 %v476_v45, %s1891_s16 }
 0xa51   :  { %v126_v39 = vpop.f32.mrf.mxu0 }
 0xa52   :  { %v127_v40 = vadd.f32 %v1998_v6, %v126_v39 }
 0xa59   :  { %v128_v41 = vpop.f32.mrf.mxu0 }
 0xa5a   :  { %v129_v42 = vadd.f32 %v1998_v6, %v128_v41 }
 0xaa3   :  { %v479_v47 = vpop.permute.xlu2 %478 }
 0xaa4   :  { %v481_v48 = vadd.f32 %v479_v47, %v471_v46 }
 0xaa6   :  { %1800 = vtanh.f32 %v481_v48 }
 0xaac   :  { %v1801_v49 = vpop.eup %1800 }
 0xaad   :  { %484 = vrot.lane.b32.xlu0 %v1801_v49, %s1891_s16 }
 0xb1f   :  { %v485_v50 = vpop.permute.xlu0 %484 }
 0xb20   :  { %v487_v51 = vmul.f32 %v485_v50, %v468_v43  ;;  %v1726_v43 = vpack.c.bf16 %v129_v42, %v127_v40 }
 0xb22   :  { %v2051_v52 = vpack.c.bf16 %v487_v51, %v487_v51  ;;  %1750 = vst [vmem:[#allocation2 + $0x18] sm:$0xff] %v1726_v43  }
 0xb24   :  { %v498_v53 = vunpack.c.l.b16 %v2051_v52 }
 0xb26   :  { %v499_v54 = vpack.c.b16 %v498_v53, %v498_v53 }
 0xb28   :  { %500 = vrot.lane.b32.xlu1 %v499_v54, %s1892_s3 }
 0xb29   :  { %v2116_v45 = vld [vmem:[#allocation2 + $0x18] sm:$0xff]  }
 0xb2a   :  { %v565_v46 = vunpack.c.l.bf16 %v2116_v45 }
 0xb9a   :  { %v501_v55 = vpop.permute.xlu1 %500 }
 0xb9b   :  { %1545 = vmatmul.msk.bf16.vlgmr.msrb.gmra.mxu3 %vm161_vm5, %v501_v55 }
 0xc1e   :  { %v514_v57 = vpop.f32.mrf.mxu3 }
 0xc1f   :  { %v518_v58 = vadd.f32 %v514_v57, %v497_v56 }
 0xc21   :  { %1802 = vtanh.f32 %v518_v58  ;;  %v1546_v61 = vmul.f32 -1.442695, %v518_v58 }
 0xc23   :  { %1804 = vpow2.f32 %v1546_v61 }
 0xc26   :  { %v516_v59 = vpop.f32.mrf.mxu3 }
 0xc27   :  { %v1803_v60 = vpop.eup %1802 }
 0xc28   :  { %541 = vrot.lane.b32.xlu2 %v1803_v60, %s1891_s16 }
 0xc29   :  { %v1805_v62 = vpop.eup %1804 }
 0xc2a   :  { %v522_v63 = vadd.f32 1.0, %v1805_v62 }
 0xc2c   :  { %1806 = vrcp.f32 %v522_v63  ;;  %v534_v8 = vand.u32 2147483648, %v522_v63  ;;  %vm528_vm9 = vweird.f32 %v522_v63  ;;  %v532_v9 = vand.u32 2147483647, %v522_v63 }
 0xc2e   :  { %v535_v11 = vor.u32 1.1754944e-38, %v534_v8  ;;  %vm533_vm11 = vcmp.eq.f32.partialorder %v532_v9, 8.507059e+37 }
 0xc30   :  { %218 = vrot.lane.b32.xlu2 %v2005_v38, %s1892_s3 }
 0xc32   :  { %v1807_v0 = vpop.eup %1806 }
 0xc33   :  { %v524_v1 = vmul.f32 %v1807_v0, %v522_v63  ;;  %vm529_vm8 = vweird.f32 %v1807_v0 }
 0xc34   :  { %vm530_vm10 = vmor %vm528_vm9, %vm529_vm8 }
 0xc35   :  { %v525_v2 = vsub.f32 1.0, %v524_v1 }
 0xc37   :  { %v526_v3 = vmul.f32 %v1807_v0, %v525_v2 }
 0xc39   :  { %v527_v5 = vadd.f32 %v1807_v0, %v526_v3 }
 0xc3b   :  { %v531_v10 = vsel %vm530_vm10, %v1807_v0, %v527_v5 }
 0xc3c   :  { %v536_v38 = vsel %vm533_vm11, %v535_v11, %v531_v10 }
 0xc3d   :  { %v539_v18 = vmul.f32 %v536_v38, %v481_v48 }
 0xc82   :  { %v542_v12 = vpop.permute.xlu2 %541 }
 0xc83   :  { %v544_v13 = vmul.f32 %v542_v12, %v536_v38 }
 0xc85   :  { %546 = vrot.lane.b32.xlu0 %v544_v13, %s1891_s16 }
 0xc8a   :  { %v219_v15 = vpop.permute.xlu2 %218 }
 0xc8b   :  { %222 = vst.msk [vmem:[#allocation3] sm:$0xf] %vm221_vm12, %v219_v15 }
 0xc8d   :  { %286 = vrot.lane.b32.xlu0 %v2019_v7, %s1892_s3 }
 0xcf7   :  { %v547_v19 = vpop.permute.xlu0 %546 }
 0xcf8   :  { %v2069_v20 = vadd.f32 %v547_v19, %v539_v18 }
 0xcfa   :  { %1808 = vtanh.f32 %v2069_v20 }
 0xcff   :  { %v287_v21 = vpop.permute.xlu0 %286 }
 0xd00   :  { %v1809_v22 = vpop.eup %1808  ;;  %290 = vst.msk [vmem:[#allocation3 + $0x4] sm:$0xf] %vm221_vm12, %v287_v21 }
 0xd01   :  { %552 = vrot.lane.b32.xlu1 %v1809_v22, %s1891_s16 }
 0xd07   :  { %v1682_v7 = vld [vmem:[#allocation3] sm:$0xff] }
 0xd08   :  { %1575 = vmatmul.msk.bf16.vlgmr.msra.gmra.mxu3 %vm161_vm5, %v1682_v7 }
 0xd73   :  { %v553_v23 = vpop.permute.xlu1 %552 }
 0xd74   :  { %v555_v24 = vmul.f32 %v553_v23, %v536_v38 }
 0xd76   :  { %v2075_v25 = vpack.c.bf16 %v555_v24, %v555_v24 }
 0xd78   :  { %v566_v26 = vunpack.c.l.b16 %v2075_v25 }
 0xd7a   :  { %v567_v28 = vpack.c.b16 %v566_v26, %v566_v26 }
 0xd7c   :  { %568 = vrot.lane.b32.xlu1 %v567_v28, %s1892_s3 }
 0xd8b   :  { %v772_v29 = vpop.f32.mrf.mxu3 }
 0xd8c   :  { %v773_v32 = vadd.f32 %v2086_v30, %v772_v29 }
 0xd93   :  { %v774_v31 = vpop.f32.mrf.mxu3 }
 0xd94   :  { %v775_v33 = vadd.f32 %v2086_v30, %v774_v31 }
 0xd96   :  { %v1731_v34 = vpack.c.bf16 %v775_v33, %v773_v32 }
 0xd98   :  { %1732 = vst [vmem:[#allocation2] sm:$0xff] %v1731_v34  }
 0xd9f   :  { %v2120_v50 = vld [vmem:[#allocation2] sm:$0xff]  }
 0xda0   :  { %v809_v51 = vunpack.c.l.bf16 %v2120_v50 }
 0xdee   :  { %v569_v37 = vpop.permute.xlu1 %568 }
 0xdef   :  { %1547 = vmatmul.msk.bf16.vlgmr.msrb.gmra.mxu1 %vm161_vm5, %v569_v37 }
 0xdf0   :  { %1008 = vmatpush.bf16.msrb.mxu1 %v2093_v35 }
 0xdf4   :  { %1009 = vmatpush.bf16.msrb.mxu1 %v2099_v36 }
 0xdff   :  { %830 = vmatmul.bf16.vlgmr.msra.gmra.mxu1 %v1890_v4 }
 0xe00   :  { %1188 = vmatpush.bf16.msra.mxu1 %v2093_v35 }
 0xe04   :  { %1189 = vmatpush.bf16.msra.mxu1 %v2099_v36 }
 0xe6c   :  { %v582_v47 = vpop.f32.mrf.mxu1 }
 0xe6d   :  { %v586_v48 = vadd.f32 %v582_v47, %v565_v46 }
 0xe6f   :  { %1810 = vtanh.f32 %v586_v48  ;;  %v1548_v56 = vmul.f32 -1.442695, %v586_v48 }
 0xe74   :  { %v584_v49 = vpop.f32.mrf.mxu1 }
 0xe75   :  { %v1811_v4 = vpop.eup %1810 }
 0xe76   :  { %609 = vrot.lane.b32.xlu2 %v1811_v4, %s1891_s16 }
 0xe7c   :  { %v831_v6 = vpop.f32.mrf.mxu1 }
 0xe7d   :  { %v835_v53 = vadd.f32 %v831_v6, %v809_v51  ;;  %v874_v51 = vunpack.c.h.bf16 %v2120_v50 }
 0xe7f   :  { %1812 = vtanh.f32 %v835_v53  ;;  %v1587_v1 = vmul.f32 -1.442695, %v835_v53 }
 0xe80   :  { %1814 = vpow2.f32 %v1548_v56 }
 0xe84   :  { %v833_v54 = vpop.f32.mrf.mxu1 }
 0xe85   :  { %v1813_v55 = vpop.eup %1812 }
 0xe86   :  { %858 = vrot.lane.b32.xlu0 %v1813_v55, %s1891_s16  ;;  %v1815_v57 = vpop.eup %1814 }
 0xe87   :  { %v590_v58 = vadd.f32 1.0, %v1815_v57 }
 0xe89   :  { %1816 = vrcp.f32 %v590_v58  ;;  %v602_v0 = vand.u32 2147483648, %v590_v58  ;;  %vm596_vm13 = vweird.f32 %v590_v58  ;;  %v600_v2 = vand.u32 2147483647, %v590_v58 }
 0xe8a   :  { %1818 = vpow2.f32 %v1587_v1 }
 0xe8b   :  { %v603_v5 = vor.u32 1.1754944e-38, %v602_v0  ;;  %vm601_vm15 = vcmp.eq.f32.partialorder %v600_v2, 8.507059e+37 }
 0xe8f   :  { %v1817_v59 = vpop.eup %1816 }
 0xe90   :  { %v592_v60 = vmul.f32 %v1817_v59, %v590_v58  ;;  %vm597_vm0 = vweird.f32 %v1817_v59  ;;  %v1819_v11 = vpop.eup %1818 }
 0xe91   :  { %vm598_vm14 = vmor %vm596_vm13, %vm597_vm0  ;;  %v839_v12 = vadd.f32 1.0, %v1819_v11 }
 0xe92   :  { %v593_v61 = vsub.f32 1.0, %v592_v60 }
 0xe93   :  { %1820 = vrcp.f32 %v839_v12  ;;  %v851_v18 = vand.u32 2147483648, %v839_v12  ;;  %vm845_vm2 = vweird.f32 %v839_v12  ;;  %v849_v19 = vand.u32 2147483647, %v839_v12 }
 0xe94   :  { %v594_v62 = vmul.f32 %v1817_v59, %v593_v61 }
 0xe95   :  { %v852_v22 = vor.u32 1.1754944e-38, %v851_v18  ;;  %vm850_vm4 = vcmp.eq.f32.partialorder %v849_v19, 8.507059e+37 }
 0xe96   :  { %v595_v63 = vadd.f32 %v1817_v59, %v594_v62 }
 0xe98   :  { %v599_v3 = vsel %vm598_vm14, %v1817_v59, %v595_v63 }
 0xe99   :  { %v604_v9 = vsel %vm601_vm15, %v603_v5, %v599_v3  ;;  %v1821_v38 = vpop.eup %1820 }
 0xe9a   :  { %v841_v13 = vmul.f32 %v1821_v38, %v839_v12  ;;  %vm846_vm1 = vweird.f32 %v1821_v38  ;;  %v607_v26 = vmul.f32 %v604_v9, %v2069_v20 }
 0xe9b   :  { %vm847_vm3 = vmor %vm845_vm2, %vm846_vm1 }
 0xe9c   :  { %v842_v15 = vsub.f32 1.0, %v841_v13 }
 0xe9e   :  { %v843_v16 = vmul.f32 %v1821_v38, %v842_v15 }
 0xea0   :  { %v844_v17 = vadd.f32 %v1821_v38, %v843_v16 }
 0xea2   :  { %v848_v21 = vsel %vm847_vm3, %v1821_v38, %v844_v17 }
 0xea3   :  { %v853_v23 = vsel %vm850_vm4, %v852_v22, %v848_v21 }
 0xea4   :  { %v856_v31 = vmul.f32 0.0, %v853_v23 }
 0xed0   :  { %v610_v8 = vpop.permute.xlu2 %609 }
 0xed1   :  { %v612_v10 = vmul.f32 %v610_v8, %v604_v9 }
 0xed3   :  { %614 = vrot.lane.b32.xlu1 %v612_v10, %s1891_s16 }
 0xef8   :  { %v859_v7 = vpop.permute.xlu0 %858 }
 0xef9   :  { %v861_v24 = vmul.f32 %v859_v7, %v853_v23 }
 0xefb   :  { %863 = vrot.lane.b32.xlu2 %v861_v24, %s1891_s16 }
 0xf45   :  { %v615_v27 = vpop.permute.xlu1 %614 }
 0xf46   :  { %v2127_v28 = vadd.f32 %v615_v27, %v607_v26 }
 0xf48   :  { %1822 = vtanh.f32 %v2127_v28 }
 0xf4e   :  { %v1823_v29 = vpop.eup %1822 }
 0xf4f   :  { %620 = vrot.lane.b32.xlu0 %v1823_v29, %s1891_s16 }
 0xf55   :  { %v864_v32 = vpop.permute.xlu2 %863 }
 0xf56   :  { %v866_v33 = vadd.f32 %v864_v32, %v856_v31 }
 0xf58   :  { %1824 = vtanh.f32 %v866_v33 }
 0xf5e   :  { %v1825_v34 = vpop.eup %1824 }
 0xf5f   :  { %869 = vrot.lane.b32.xlu1 %v1825_v34, %s1891_s16 }
 0xfc1   :  { %v621_v37 = vpop.permute.xlu0 %620 }
 0xfc2   :  { %v623_v39 = vmul.f32 %v621_v37, %v604_v9 }
 0xfc4   :  { %v2132_v40 = vpack.c.bf16 %v623_v39, %v623_v39 }
 0xfc6   :  { %v634_v20 = vunpack.c.l.b16 %v2132_v40 }
 0xfc8   :  { %v635_v41 = vpack.c.b16 %v634_v20, %v634_v20 }
 0xfca   :  { %636 = vrot.lane.b32.xlu2 %v635_v41, %s1892_s3 }
 0xfd1   :  { %v870_v42 = vpop.permute.xlu1 %869 }
 0xfd2   :  { %v872_v43 = vmul.f32 %v870_v42, %v853_v23 }
 0xfd4   :  { %v875_v46 = vpack.c.bf16 %v872_v43, %v872_v43 }
 0xfd6   :  { %877 = vrot.lane.b32.xlu0 %v875_v46, %s1892_s3 }
0x1024   :  { %v637_v47 = vpop.permute.xlu2 %636 }
0x1025   :  { %1549 = vmatmul.msk.bf16.vlgmr.msrb.gmra.mxu2 %vm161_vm5, %v637_v47 }
0x1026   :  { %1068 = vmatpush.bf16.msrb.mxu2 %v2093_v35 }
0x102a   :  { %1069 = vmatpush.bf16.msrb.mxu2 %v2099_v36 }
0x1048   :  { %v878_v48 = vpop.permute.xlu0 %877 }
0x1049   :  { %1588 = vmatmul.msk.bf16.vlgmr.msra.gmra.mxu2 %vm161_vm5, %v878_v48 }
0x104a   :  { %1248 = vmatpush.bf16.msra.mxu2 %v2093_v35 }
0x104e   :  { %1249 = vmatpush.bf16.msra.mxu2 %v2099_v36 }
0x10a8   :  { %v2143_v49 = vpop.f32.mrf.mxu2 }
0x10b0   :  { %v652_v4 = vpop.f32.mrf.mxu2 }
0x10cc   :  { %v891_v6 = vpop.f32.mrf.mxu2 }
0x10cd   :  { %v895_v53 = vadd.f32 %v891_v6, %v874_v51 }
0x10cf   :  { %1826 = vtanh.f32 %v895_v53  ;;  %v1589_v56 = vmul.f32 -1.442695, %v895_v53 }
0x10d1   :  { %1828 = vpow2.f32 %v1589_v56 }
0x10d4   :  { %v893_v54 = vpop.f32.mrf.mxu2 }
0x10d5   :  { %v1827_v55 = vpop.eup %1826 }
0x10d6   :  { %918 = vrot.lane.b32.xlu1 %v1827_v55, %s1891_s16 }
0x10d7   :  { %v1829_v35 = vpop.eup %1828 }
0x10d8   :  { %v899_v57 = vadd.f32 1.0, %v1829_v35 }
0x10da   :  { %1830 = vrcp.f32 %v899_v57  ;;  %v911_v61 = vand.u32 2147483648, %v899_v57  ;;  %vm905_vm7 = vweird.f32 %v899_v57  ;;  %v909_v62 = vand.u32 2147483647, %v899_v57 }
0x10dc   :  { %v912_v0 = vor.u32 1.1754944e-38, %v911_v61  ;;  %vm910_vm9 = vcmp.eq.f32.partialorder %v909_v62, 8.507059e+37 }
0x10de   :  { %354 = vrot.lane.b32.xlu1 %v2029_v44, %s1892_s3 }
0x10e0   :  { %v1831_v36 = vpop.eup %1830 }
0x10e1   :  { %v901_v58 = vmul.f32 %v1831_v36, %v899_v57  ;;  %vm906_vm6 = vweird.f32 %v1831_v36 }
0x10e2   :  { %vm907_vm8 = vmor %vm905_vm7, %vm906_vm6 }
0x10e3   :  { %v902_v59 = vsub.f32 1.0, %v901_v58 }
0x10e5   :  { %v903_v60 = vmul.f32 %v1831_v36, %v902_v59 }
0x10e7   :  { %v904_v50 = vadd.f32 %v1831_v36, %v903_v60 }
0x10e9   :  { %v908_v63 = vsel %vm907_vm8, %v1831_v36, %v904_v50 }
0x10ea   :  { %v913_v44 = vsel %vm910_vm9, %v912_v0, %v908_v63 }
0x10eb   :  { %v916_v5 = vmul.f32 %v913_v44, %v866_v33 }
0x1148   :  { %v919_v1 = vpop.permute.xlu1 %918 }
0x1149   :  { %v921_v2 = vmul.f32 %v919_v1, %v913_v44 }
0x114b   :  { %923 = vrot.lane.b32.xlu2 %v921_v2, %s1891_s16 }
0x1150   :  { %v355_v3 = vpop.permute.xlu1 %354 }
0x1151   :  { %358 = vst.msk [vmem:[#allocation3 + $0x8] sm:$0xf] %vm221_vm12, %v355_v3 }
0x1153   :  { %422 = vrot.lane.b32.xlu2 %v2041_v14, %s1892_s3 }
0x11a5   :  { %v924_v8 = vpop.permute.xlu2 %923 }
0x11a6   :  { %v926_v9 = vadd.f32 %v924_v8, %v916_v5 }
0x11a8   :  { %1832 = vtanh.f32 %v926_v9 }
0x11ad   :  { %v423_v10 = vpop.permute.xlu2 %422 }
0x11ae   :  { %v1833_v11 = vpop.eup %1832  ;;  %426 = vst.msk [vmem:[#allocation3 + $0xc] sm:$0xf] %vm221_vm12, %v423_v10 }
0x11af   :  { %929 = vrot.lane.b32.xlu0 %v1833_v11, %s1891_s16 }
0x11b5   :  { %v1683_v12 = vld [vmem:[#allocation3 + $0x8] sm:$0xff] }
0x11b6   :  { %1576 = vmatmul.msk.bf16.gmra.mxu3 %vm161_vm5, %v1683_v12 }
0x1221   :  { %v930_v38 = vpop.permute.xlu0 %929 }
0x1222   :  { %v932_v13 = vmul.f32 %v930_v38, %v913_v44 }
0x1224   :  { %v935_v15 = vpack.c.bf16 %v932_v13, %v932_v13 }
0x1226   :  { %937 = vrot.lane.b32.xlu0 %v935_v15, %s1892_s3 }
0x1239   :  { %v777_v16 = vpop.f32.mrf.mxu3 }
0x123a   :  { %v778_v17 = vadd.f32 %v2086_v30, %v777_v16 }
0x1241   :  { %v779_v14 = vpop.f32.mrf.mxu3 }
0x1242   :  { %v780_v18 = vadd.f32 %v2086_v30, %v779_v14 }
0x1244   :  { %v1736_v19 = vpack.c.bf16 %v780_v18, %v778_v17 }
0x1246   :  { %1751 = vst [vmem:[#allocation2 + $0x8] sm:$0xff] %v1736_v19  }
0x124d   :  { %v933_v22 = vld [vmem:[#allocation2 + $0x8] sm:$0xff]  }
0x124e   :  { %v934_v7 = vunpack.c.l.bf16 %v933_v22  ;;  %v994_v36 = vunpack.c.h.bf16 %v933_v22 }
0x1298   :  { %v938_v21 = vpop.permute.xlu0 %937 }
0x1299   :  { %1590 = vmatmul.msk.bf16.vlgmr.msrb.gmra.mxu0 %vm161_vm5, %v938_v21 }
0x1316   :  { %v951_v23 = vpop.f32.mrf.mxu0 }
0x1317   :  { %v955_v24 = vadd.f32 %v951_v23, %v934_v7 }
0x1319   :  { %1834 = vtanh.f32 %v955_v24  ;;  %v1591_v29 = vmul.f32 -1.442695, %v955_v24 }
0x131b   :  { %1836 = vpow2.f32 %v1591_v29 }
0x131e   :  { %v953_v26 = vpop.f32.mrf.mxu0 }
0x131f   :  { %v1835_v27 = vpop.eup %1834 }
0x1320   :  { %978 = vrot.lane.b32.xlu1 %v1835_v27, %s1891_s16 }
0x1321   :  { %v1837_v31 = vpop.eup %1836 }
0x1322   :  { %v959_v32 = vadd.f32 1.0, %v1837_v31 }
0x1324   :  { %1838 = vrcp.f32 %v959_v32  ;;  %v971_v41 = vand.u32 2147483648, %v959_v32  ;;  %vm965_vm11 = vweird.f32 %v959_v32  ;;  %v969_v42 = vand.u32 2147483647, %v959_v32 }
0x1326   :  { %v972_v46 = vor.u32 1.1754944e-38, %v971_v41  ;;  %vm970_vm13 = vcmp.eq.f32.partialorder %v969_v42, 8.507059e+37 }
0x132a   :  { %v1839_v33 = vpop.eup %1838 }
0x132b   :  { %v961_v34 = vmul.f32 %v1839_v33, %v959_v32  ;;  %vm966_vm10 = vweird.f32 %v1839_v33 }
0x132c   :  { %vm967_vm0 = vmor %vm965_vm11, %vm966_vm10 }
0x132d   :  { %v962_v37 = vsub.f32 1.0, %v961_v34 }
0x132f   :  { %v963_v39 = vmul.f32 %v1839_v33, %v962_v37 }
0x1331   :  { %v964_v20 = vadd.f32 %v1839_v33, %v963_v39 }
0x1333   :  { %v968_v43 = vsel %vm967_vm0, %v1839_v33, %v964_v20 }
0x1334   :  { %v973_v48 = vsel %vm970_vm13, %v972_v46, %v968_v43 }
0x1335   :  { %v976_v51 = vmul.f32 %v973_v48, %v926_v9 }
0x1392   :  { %v979_v47 = vpop.permute.xlu1 %978 }
0x1393   :  { %v981_v4 = vmul.f32 %v979_v47, %v973_v48 }
0x1395   :  { %983 = vrot.lane.b32.xlu2 %v981_v4, %s1891_s16 }
0x13ef   :  { %v984_v6 = vpop.permute.xlu2 %983 }
0x13f0   :  { %v986_v53 = vadd.f32 %v984_v6, %v976_v51 }
0x13f2   :  { %1840 = vtanh.f32 %v986_v53 }
0x13f8   :  { %v1841_v54 = vpop.eup %1840 }
0x13f9   :  { %989 = vrot.lane.b32.xlu0 %v1841_v54, %s1891_s16 }
0x146b   :  { %v990_v55 = vpop.permute.xlu0 %989 }
0x146c   :  { %v992_v56 = vmul.f32 %v990_v55, %v973_v48 }
0x146e   :  { %v995_v35 = vpack.c.bf16 %v992_v56, %v992_v56 }
0x1470   :  { %997 = vrot.lane.b32.xlu1 %v995_v35, %s1892_s3 }
0x14e2   :  { %v998_v57 = vpop.permute.xlu1 %997 }
0x14e3   :  { %1592 = vmatmul.msk.bf16.vlgmr.msrb.gmra.mxu1 %vm161_vm5, %v998_v57 }
0x1560   :  { %v1011_v58 = vpop.f32.mrf.mxu1 }
0x1561   :  { %v1015_v59 = vadd.f32 %v1011_v58, %v994_v36 }
0x1563   :  { %1842 = vtanh.f32 %v1015_v59  ;;  %v1593_v61 = vmul.f32 -1.442695, %v1015_v59 }
0x1565   :  { %1844 = vpow2.f32 %v1593_v61 }
0x1568   :  { %v1013_v60 = vpop.f32.mrf.mxu1 }
0x1569   :  { %v1843_v50 = vpop.eup %1842 }
0x156a   :  { %1038 = vrot.lane.b32.xlu2 %v1843_v50, %s1891_s16 }
0x156b   :  { %v1845_v62 = vpop.eup %1844 }
0x156c   :  { %v1019_v63 = vadd.f32 1.0, %v1845_v62 }
0x156e   :  { %1846 = vrcp.f32 %v1019_v63  ;;  %v1031_v5 = vand.u32 2147483648, %v1019_v63  ;;  %vm1025_vm15 = vweird.f32 %v1019_v63  ;;  %v1029_v8 = vand.u32 2147483647, %v1019_v63 }
0x1570   :  { %v1032_v10 = vor.u32 1.1754944e-38, %v1031_v5  ;;  %vm1030_vm2 = vcmp.eq.f32.partialorder %v1029_v8, 8.507059e+37 }
0x1572   :  { %490 = vrot.lane.b32.xlu2 %v2051_v52, %s1892_s3 }
0x1574   :  { %v1847_v0 = vpop.eup %1846 }
0x1575   :  { %v1021_v1 = vmul.f32 %v1847_v0, %v1019_v63  ;;  %vm1026_vm14 = vweird.f32 %v1847_v0 }
0x1576   :  { %vm1027_vm1 = vmor %vm1025_vm15, %vm1026_vm14 }
0x1577   :  { %v1022_v44 = vsub.f32 1.0, %v1021_v1 }
0x1579   :  { %v1023_v2 = vmul.f32 %v1847_v0, %v1022_v44 }
0x157b   :  { %v1024_v3 = vadd.f32 %v1847_v0, %v1023_v2 }
0x157d   :  { %v1028_v9 = vsel %vm1027_vm1, %v1847_v0, %v1024_v3 }
0x157e   :  { %v1033_v52 = vsel %vm1030_vm2, %v1032_v10, %v1028_v9 }
0x157f   :  { %v1036_v13 = vmul.f32 %v1033_v52, %v986_v53  ;;  %v633_v53 = vunpack.c.h.bf16 %v2116_v45 }
0x1581   :  { %v654_v55 = vadd.f32 %v2143_v49, %v633_v53 }
0x1583   :  { %v1550_v50 = vmul.f32 -1.442695, %v654_v55 }
0x15c4   :  { %v1039_v11 = vpop.permute.xlu2 %1038 }
0x15c5   :  { %v1041_v12 = vmul.f32 %v1039_v11, %v1033_v52 }
0x15c7   :  { %1043 = vrot.lane.b32.xlu0 %v1041_v12, %s1891_s16 }
0x15cc   :  { %v491_v38 = vpop.permute.xlu2 %490 }
0x15cd   :  { %494 = vst.msk [vmem:[#allocation3 + $0x10] sm:$0xf] %vm221_vm12, %v491_v38 }
0x15cf   :  { %558 = vrot.lane.b32.xlu0 %v2075_v25, %s1892_s3 }
0x1639   :  { %v1044_v15 = vpop.permute.xlu0 %1043 }
0x163a   :  { %v1046_v16 = vadd.f32 %v1044_v15, %v1036_v13 }
0x163c   :  { %1848 = vtanh.f32 %v1046_v16 }
0x1641   :  { %v559_v14 = vpop.permute.xlu0 %558 }
0x1642   :  { %v1849_v17 = vpop.eup %1848  ;;  %562 = vst.msk [vmem:[#allocation3 + $0x14] sm:$0xf] %vm221_vm12, %v559_v14 }
0x1643   :  { %1049 = vrot.lane.b32.xlu1 %v1849_v17, %s1891_s16 }
0x1649   :  { %v1684_v18 = vld [vmem:[#allocation3 + $0x10] sm:$0xff] }
0x164a   :  { %1577 = vmatmul.msk.bf16.gmra.mxu3 %vm161_vm5, %v1684_v18 }
0x16b5   :  { %v1050_v19 = vpop.permute.xlu1 %1049 }
0x16b6   :  { %v1052_v21 = vmul.f32 %v1050_v19, %v1033_v52 }
0x16b8   :  { %v1055_v22 = vpack.c.bf16 %v1052_v21, %v1052_v21 }
0x16ba   :  { %1057 = vrot.lane.b32.xlu1 %v1055_v22, %s1892_s3 }
0x16cd   :  { %v782_v7 = vpop.f32.mrf.mxu3 }
0x16ce   :  { %v783_v23 = vadd.f32 %v2086_v30, %v782_v7 }
0x16d5   :  { %v784_v25 = vpop.f32.mrf.mxu3 }
0x16d6   :  { %v785_v24 = vadd.f32 %v2086_v30, %v784_v25 }
0x16d8   :  { %v1741_v26 = vpack.c.bf16 %v785_v24, %v783_v23 }
0x16da   :  { %1752 = vst [vmem:[#allocation2 + $0x10] sm:$0xff] %v1741_v26  }
0x16e1   :  { %v2179_v29 = vld [vmem:[#allocation2 + $0x10] sm:$0xff]  }
0x16e2   :  { %v1054_v31 = vunpack.c.l.bf16 %v2179_v29  ;;  %v1114_v15 = vunpack.c.h.bf16 %v2179_v29 }
0x172c   :  { %v1058_v27 = vpop.permute.xlu1 %1057 }
0x172d   :  { %1594 = vmatmul.msk.bf16.vlgmr.msrb.gmra.mxu2 %vm161_vm5, %v1058_v27 }
0x17b0   :  { %v1071_v32 = vpop.f32.mrf.mxu2 }
0x17b1   :  { %v1075_v33 = vadd.f32 %v1071_v32, %v1054_v31 }
0x17b3   :  { %1850 = vtanh.f32 %v1075_v33  ;;  %v1595_v39 = vmul.f32 -1.442695, %v1075_v33 }
0x17b5   :  { %1852 = vpow2.f32 %v1595_v39 }
0x17b8   :  { %v1073_v34 = vpop.f32.mrf.mxu2 }
0x17b9   :  { %v1851_v37 = vpop.eup %1850 }
0x17ba   :  { %1098 = vrot.lane.b32.xlu2 %v1851_v37, %s1891_s16 }
0x17bb   :  { %v1853_v20 = vpop.eup %1852 }
0x17bc   :  { %v1079_v41 = vadd.f32 1.0, %v1853_v20 }
0x17be   :  { %1854 = vrcp.f32 %v1079_v41  ;;  %v1091_v4 = vand.u32 2147483648, %v1079_v41  ;;  %vm1085_vm4 = vweird.f32 %v1079_v41  ;;  %v1089_v51 = vand.u32 2147483647, %v1079_v41 }
0x17bf   :  { %1856 = vtanh.f32 %v654_v55 }
0x17c0   :  { %v1092_v54 = vor.u32 1.1754944e-38, %v1091_v4  ;;  %vm1090_vm7 = vcmp.eq.f32.partialorder %v1089_v51, 8.507059e+37 }
0x17c4   :  { %v1855_v42 = vpop.eup %1854 }
0x17c5   :  { %v1081_v43 = vmul.f32 %v1855_v42, %v1079_v41  ;;  %vm1086_vm3 = vweird.f32 %v1855_v42  ;;  %v1857_v36 = vpop.eup %1856 }
0x17c6   :  { %vm1087_vm6 = vmor %vm1085_vm4, %vm1086_vm3 }
0x17c7   :  { %v1082_v46 = vsub.f32 1.0, %v1081_v43 }
0x17c9   :  { %v1083_v47 = vmul.f32 %v1855_v42, %v1082_v46 }
0x17cb   :  { %v1084_v48 = vadd.f32 %v1855_v42, %v1083_v47 }
0x17cd   :  { %v1088_v6 = vsel %vm1087_vm6, %v1855_v42, %v1084_v48 }
0x17ce   :  { %v1093_v35 = vsel %vm1090_vm7, %v1092_v54, %v1088_v6 }
0x17cf   :  { %v1096_v58 = vmul.f32 %v1093_v35, %v1046_v16 }
0x1814   :  { %v1099_v56 = vpop.permute.xlu2 %1098 }
0x1815   :  { %v1101_v57 = vmul.f32 %v1099_v56, %v1093_v35 }
0x1817   :  { %1103 = vrot.lane.b32.xlu0 %v1101_v57, %s1891_s16 }
0x181f   :  { %677 = vrot.lane.b32.xlu0 %v1857_v36, %s1891_s16 }
0x1889   :  { %v1104_v59 = vpop.permute.xlu0 %1103 }
0x188a   :  { %v2187_v60 = vadd.f32 %v1104_v59, %v1096_v58 }
0x188c   :  { %1858 = vtanh.f32 %v2187_v60 }
0x188d   :  { %1860 = vpow2.f32 %v1550_v50 }
0x1891   :  { %v678_v52 = vpop.permute.xlu0 %677 }
0x1892   :  { %v1859_v45 = vpop.eup %1858 }
0x1893   :  { %1109 = vrot.lane.b32.xlu1 %v1859_v45, %s1891_s16  ;;  %v1861_v49 = vpop.eup %1860 }
0x1894   :  { %v658_v61 = vadd.f32 1.0, %v1861_v49 }
0x1896   :  { %1862 = vrcp.f32 %v658_v61  ;;  %v670_v8 = vand.u32 2147483648, %v658_v61  ;;  %vm664_vm9 = vweird.f32 %v658_v61  ;;  %v668_v9 = vand.u32 2147483647, %v658_v61 }
0x1898   :  { %v671_v11 = vor.u32 1.1754944e-38, %v670_v8  ;;  %vm669_vm11 = vcmp.eq.f32.partialorder %v668_v9, 8.507059e+37 }
0x189c   :  { %v1863_v62 = vpop.eup %1862 }
0x189d   :  { %v660_v63 = vmul.f32 %v1863_v62, %v658_v61  ;;  %vm665_vm8 = vweird.f32 %v1863_v62 }
0x189e   :  { %vm666_vm10 = vmor %vm664_vm9, %vm665_vm8 }
0x189f   :  { %v661_v0 = vsub.f32 1.0, %v660_v63 }
0x18a1   :  { %v662_v1 = vmul.f32 %v1863_v62, %v661_v0 }
0x18a3   :  { %v663_v3 = vadd.f32 %v1863_v62, %v662_v1 }
0x18a5   :  { %v667_v10 = vsel %vm666_vm10, %v1863_v62, %v663_v3 }
0x18a6   :  { %v672_v12 = vsel %vm669_vm11, %v671_v11, %v667_v10 }
0x18a7   :  { %v680_v38 = vmul.f32 %v678_v52, %v672_v12  ;;  %v675_v18 = vmul.f32 %v672_v12, %v2127_v28 }
0x1905   :  { %v1110_v44 = vpop.permute.xlu1 %1109 }
0x1906   :  { %v1112_v2 = vmul.f32 %v1110_v44, %v1093_v35 }
0x1908   :  { %v1115_v5 = vpack.c.bf16 %v1112_v2, %v1112_v2 }
0x190a   :  { %1117 = vrot.lane.b32.xlu2 %v1115_v5, %s1892_s3 }
0x1912   :  { %682 = vrot.lane.b32.xlu2 %v680_v38, %s1891_s16 }
0x1964   :  { %v1118_v13 = vpop.permute.xlu2 %1117 }
0x1965   :  { %1596 = vmatmul.msk.bf16.vlgmr.msra.gmra.mxu0 %vm161_vm5, %v1118_v13 }
0x196c   :  { %v683_v17 = vpop.permute.xlu2 %682 }
0x196d   :  { %v685_v19 = vadd.f32 %v683_v17, %v675_v18 }
0x19e2   :  { %v1131_v16 = vpop.f32.mrf.mxu0 }
0x19e3   :  { %v1135_v14 = vadd.f32 %v1131_v16, %v1114_v15 }
0x19e5   :  { %1864 = vtanh.f32 %v1135_v14  ;;  %v1597_v25 = vmul.f32 -1.442695, %v1135_v14 }
0x19e6   :  { %1866 = vtanh.f32 %v685_v19 }
0x19e7   :  { %1868 = vpow2.f32 %v1597_v25 }
0x19ea   :  { %v1133_v21 = vpop.f32.mrf.mxu0 }
0x19eb   :  { %v1865_v22 = vpop.eup %1864 }
0x19ec   :  { %1158 = vrot.lane.b32.xlu1 %v1865_v22, %s1891_s16  ;;  %v1867_v7 = vpop.eup %1866 }
0x19ed   :  { %v1869_v23 = vpop.eup %1868 }
0x19ee   :  { %v1139_v24 = vadd.f32 1.0, %v1869_v23 }
0x19f0   :  { %1870 = vrcp.f32 %v1139_v24  ;;  %v1151_v28 = vand.u32 2147483648, %v1139_v24  ;;  %vm1145_vm13 = vweird.f32 %v1139_v24  ;;  %v1149_v33 = vand.u32 2147483647, %v1139_v24 }
0x19f2   :  { %v1152_v37 = vor.u32 1.1754944e-38, %v1151_v28  ;;  %vm1150_vm15 = vcmp.eq.f32.partialorder %v1149_v33, 8.507059e+37 }
0x19f4   :  { %688 = vrot.lane.b32.xlu1 %v1867_v7, %s1891_s16 }
0x19f6   :  { %v1871_v26 = vpop.eup %1870 }
0x19f7   :  { %v1141_v27 = vmul.f32 %v1871_v26, %v1139_v24  ;;  %vm1146_vm0 = vweird.f32 %v1871_v26 }
0x19f8   :  { %vm1147_vm14 = vmor %vm1145_vm13, %vm1146_vm0 }
0x19f9   :  { %v1142_v29 = vsub.f32 1.0, %v1141_v27 }
0x19fb   :  { %v1143_v31 = vmul.f32 %v1871_v26, %v1142_v29 }
0x19fd   :  { %v1144_v32 = vadd.f32 %v1871_v26, %v1143_v31 }
0x19ff   :  { %v1148_v34 = vsel %vm1147_vm14, %v1871_v26, %v1144_v32 }
0x1a00   :  { %v1153_v20 = vsel %vm1150_vm15, %v1152_v37, %v1148_v34 }
0x1a01   :  { %v1156_v47 = vmul.f32 %v1153_v20, %v2187_v60 }
0x1a5e   :  { %v1159_v39 = vpop.permute.xlu1 %1158 }
0x1a5f   :  { %v1161_v41 = vmul.f32 %v1159_v39, %v1153_v20 }
0x1a61   :  { %1163 = vrot.lane.b32.xlu0 %v1161_v41, %s1891_s16 }
0x1a66   :  { %v689_v42 = vpop.permute.xlu1 %688 }
0x1a67   :  { %v691_v43 = vmul.f32 %v689_v42, %v672_v12 }
0x1a69   :  { %v692_v46 = vpack.c.bf16 %v691_v43, %v691_v43  ;;  %626 = vrot.lane.b32.xlu0 %v2132_v40, %s1892_s3 }
0x1a6b   :  { %694 = vrot.lane.b32.xlu1 %v692_v46, %s1892_s3 }
0x1ad3   :  { %v1164_v48 = vpop.permute.xlu0 %1163 }
0x1ad4   :  { %v1166_v4 = vadd.f32 %v1164_v48, %v1156_v47 }
0x1ad6   :  { %1872 = vtanh.f32 %v1166_v4 }
0x1adb   :  { %v627_v51 = vpop.permute.xlu0 %626 }
0x1adc   :  { %v1873_v6 = vpop.eup %1872  ;;  %630 = vst.msk [vmem:[#allocation3 + $0x18] sm:$0xf] %vm221_vm12, %v627_v51 }
0x1add   :  { %1169 = vrot.lane.b32.xlu2 %v1873_v6, %s1891_s16  ;;  %v695_v53 = vpop.permute.xlu1 %694 }
0x1ade   :  { %698 = vst.msk [vmem:[#allocation3 + $0x1c] sm:$0xf] %vm221_vm12, %v695_v53  ;;  %v1691_v53 = vld [vmem:[%s2294_s7 + $0x8] sm:$0xff] }
0x1adf   :  { %1326 = vmatpush.bf16.msrb.mxu0 %v1691_v53 }
0x1ae5   :  { %v1685_v54 = vld [vmem:[#allocation3 + $0x18] sm:$0xff] }
0x1ae6   :  { %1578 = vmatmul.msk.bf16.gmra.mxu3 %vm161_vm5, %v1685_v54  ;;  %v1690_v54 = vld [vmem:[%s2294_s7] sm:$0xff] }
0x1ae7   :  { %1327 = vmatpush.bf16.msrb.mxu0 %v1690_v54 }
0x1b37   :  { %v1170_v40 = vpop.permute.xlu2 %1169 }
0x1b38   :  { %v1172_v55 = vmul.f32 %v1170_v40, %v1153_v20 }
0x1b3a   :  { %v1175_v56 = vpack.c.bf16 %v1172_v55, %v1172_v55 }
0x1b3c   :  { %1177 = vrot.lane.b32.xlu2 %v1175_v56, %s1892_s3 }
0x1b69   :  { %v787_v35 = vpop.f32.mrf.mxu3 }
0x1b6a   :  { %v788_v36 = vadd.f32 %v2086_v30, %v787_v35  ;;  %v1699_v35 = vld [vmem:[%s2296_s9 + $0x38] sm:$0xff] }
0x1b6b   :  { %1403 = vmatpush.bf16.msrb.mxu3 %v1699_v35 }
0x1b71   :  { %v789_v57 = vpop.f32.mrf.mxu3 }
0x1b72   :  { %v790_v58 = vadd.f32 %v2086_v30, %v789_v57  ;;  %v1698_v57 = vld [vmem:[%s2296_s9 + $0x30] sm:$0xff] }
0x1b73   :  { %1404 = vmatpush.bf16.msrb.mxu3 %v1698_v57 }
0x1b74   :  { %v1746_v59 = vpack.c.bf16 %v790_v58, %v788_v36  ;;  %v1697_v36 = vld [vmem:[%s2296_s9 + $0x28] sm:$0xff]  ;;  %v1696_v58 = vld [vmem:[%s2296_s9 + $0x20] sm:$0xff] }
0x1b76   :  { %1753 = vst [vmem:[#allocation2 + $0x18] sm:$0xff] %v1746_v59   ;;  %v1695_v59 = vld [vmem:[%s2296_s9 + $0x18] sm:$0xff] }
0x1b77   :  { %1405 = vmatpush.bf16.msrb.mxu3 %v1697_v36 }
0x1b7b   :  { %1406 = vmatpush.bf16.msrb.mxu3 %v1696_v58 }
0x1b7d   :  { %v1173_v45 = vld [vmem:[#allocation2 + $0x18] sm:$0xff]  }
0x1b7e   :  { %v1174_v50 = vunpack.c.l.bf16 %v1173_v45  ;;  %v1234_v7 = vunpack.c.h.bf16 %v1173_v45  ;;  %v1693_v45 = vld [vmem:[%s2296_s9 + $0x8] sm:$0xff] }
0x1b7f   :  { %1407 = vmatpush.bf16.msrb.mxu3 %v1695_v59 }
0x1b96   :  { %v1178_v60 = vpop.permute.xlu2 %1177 }
0x1b97   :  { %1598 = vmatmul.msk.bf16.vlgmr.msra.gmra.mxu1 %vm161_vm5, %v1178_v60  ;;  %v1694_v60 = vld [vmem:[%s2296_s9 + $0x10] sm:$0xff] }
0x1b98   :  { %1408 = vmatpush.bf16.msrb.mxu3 %v1694_v60 }
0x1b9c   :  { %1409 = vmatpush.bf16.msrb.mxu3 %v1693_v45 }
0x1c14   :  { %v1191_v49 = vpop.f32.mrf.mxu1 }
0x1c15   :  { %v1195_v61 = vadd.f32 %v1191_v49, %v1174_v50  ;;  %v1692_v50 = vld [vmem:[%s2296_s9] sm:$0xff] }
0x1c16   :  { %1410 = vmatpush.bf16.msrb.mxu3 %v1692_v50 }
0x1c17   :  { %1874 = vtanh.f32 %v1195_v61  ;;  %v1599_v0 = vmul.f32 -1.442695, %v1195_v61  ;;  %v1707_v61 = vld [vmem:[%s2298_s11 + $0x38] sm:$0xff] }
0x1c18   :  { %1486 = vmatpush.bf16.msrb.mxu1 %v1707_v61 }
0x1c19   :  { %1876 = vpow2.f32 %v1599_v0  ;;  %v1704_v0 = vld [vmem:[%s2298_s11 + $0x20] sm:$0xff] }
0x1c1c   :  { %v1193_v62 = vpop.f32.mrf.mxu1 }
0x1c1d   :  { %v1875_v63 = vpop.eup %1874  ;;  %v1706_v62 = vld [vmem:[%s2298_s11 + $0x30] sm:$0xff] }
0x1c1e   :  { %1218 = vrot.lane.b32.xlu0 %v1875_v63, %s1891_s16  ;;  %1487 = vmatpush.bf16.msrb.mxu1 %v1706_v62  ;;  %v1705_v63 = vld [vmem:[%s2298_s11 + $0x28] sm:$0xff] }
0x1c1f   :  { %v1877_v1 = vpop.eup %1876 }
0x1c20   :  { %v1199_v44 = vadd.f32 1.0, %v1877_v1  ;;  %v1703_v1 = vld [vmem:[%s2298_s11 + $0x18] sm:$0xff] }
0x1c22   :  { %1878 = vrcp.f32 %v1199_v44  ;;  %v1211_v9 = vand.u32 2147483648, %v1199_v44  ;;  %vm1205_vm1 = vweird.f32 %v1199_v44  ;;  %v1209_v10 = vand.u32 2147483647, %v1199_v44  ;;  %1488 = vmatpush.bf16.msrb.mxu1 %v1705_v63 }
0x1c24   :  { %v1212_v52 = vor.u32 1.1754944e-38, %v1211_v9  ;;  %vm1210_vm3 = vcmp.eq.f32.partialorder %v1209_v10, 8.507059e+37  ;;  %v1701_v10 = vld [vmem:[%s2298_s11 + $0x8] sm:$0xff] }
0x1c26   :  { %1489 = vmatpush.bf16.msrb.mxu1 %v1704_v0 }
0x1c28   :  { %v1879_v30 = vpop.eup %1878 }
0x1c29   :  { %v1201_v2 = vmul.f32 %v1879_v30, %v1199_v44  ;;  %vm1206_vm12 = vweird.f32 %v1879_v30  ;;  %v1702_v44 = vld [vmem:[%s2298_s11 + $0x10] sm:$0xff] }
0x1c2a   :  { %vm1207_vm2 = vmor %vm1205_vm1, %vm1206_vm12  ;;  %1490 = vmatpush.bf16.msrb.mxu1 %v1703_v1 }
0x1c2b   :  { %v1202_v3 = vsub.f32 1.0, %v1201_v2 }
0x1c2d   :  { %v1203_v5 = vmul.f32 %v1879_v30, %v1202_v3 }
0x1c2e   :  { %1491 = vmatpush.bf16.msrb.mxu1 %v1702_v44 }
0x1c2f   :  { %v1204_v8 = vadd.f32 %v1879_v30, %v1203_v5 }
0x1c31   :  { %v1208_v11 = vsel %vm1207_vm2, %v1879_v30, %v1204_v8  ;;  %v1759_v30 = vld [vmem:[%s2295_s8] ss:$0 sm:$0xff] }
0x1c32   :  { %v1213_v38 = vsel %vm1210_vm3, %v1212_v52, %v1208_v11  ;;  %1492 = vmatpush.bf16.msrb.mxu1 %v1701_v10  ;;  %v1700_v11 = vld [vmem:[%s2298_s11] sm:$0xff] }
0x1c33   :  { %v1216_v15 = vmul.f32 %v1213_v38, %v1166_v4  ;;  %v1760_v52 = vld [vmem:[%s2297_s10] ss:$0 sm:$0xff] }
0x1c36   :  { %1493 = vmatpush.bf16.msrb.mxu1 %v1700_v11 }
0x1c90   :  { %v1219_v12 = vpop.permute.xlu0 %1218 }
0x1c91   :  { %v1221_v13 = vmul.f32 %v1219_v12, %v1213_v38 }
0x1c93   :  { %1223 = vrot.lane.b32.xlu1 %v1221_v13, %s1891_s16 }
0x1d05   :  { %v1224_v16 = vpop.permute.xlu1 %1223 }
0x1d06   :  { %v1226_v14 = vadd.f32 %v1224_v16, %v1216_v15 }
0x1d08   :  { %1880 = vtanh.f32 %v1226_v14 }
0x1d0e   :  { %v1881_v17 = vpop.eup %1880 }
0x1d0f   :  { %1229 = vrot.lane.b32.xlu2 %v1881_v17, %s1891_s16 }
0x1d69   :  { %v1230_v18 = vpop.permute.xlu2 %1229 }
0x1d6a   :  { %v1232_v19 = vmul.f32 %v1230_v18, %v1213_v38 }
0x1d6c   :  { %v1235_v21 = vpack.c.bf16 %v1232_v19, %v1232_v19 }
0x1d6e   :  { %1237 = vrot.lane.b32.xlu0 %v1235_v21, %s1892_s3 }
0x1de0   :  { %v1238_v22 = vpop.permute.xlu0 %1237 }
0x1de1   :  { %1600 = vmatmul.msk.bf16.vlgmr.msra.gmra.mxu2 %vm161_vm5, %v1238_v22 }
0x1e64   :  { %v1251_v25 = vpop.f32.mrf.mxu2 }
0x1e65   :  { %v1255_v23 = vadd.f32 %v1251_v25, %v1234_v7 }
0x1e67   :  { %1882 = vtanh.f32 %v1255_v23  ;;  %v1601_v27 = vmul.f32 -1.442695, %v1255_v23 }
0x1e69   :  { %1884 = vpow2.f32 %v1601_v27 }
0x1e6c   :  { %v1253_v24 = vpop.f32.mrf.mxu2 }
0x1e6d   :  { %v1883_v26 = vpop.eup %1882 }
0x1e6e   :  { %1278 = vrot.lane.b32.xlu1 %v1883_v26, %s1891_s16 }
0x1e6f   :  { %v1885_v29 = vpop.eup %1884 }
0x1e70   :  { %v1259_v31 = vadd.f32 1.0, %v1885_v29 }
0x1e72   :  { %1886 = vrcp.f32 %v1259_v31  ;;  %v1271_v39 = vand.u32 2147483648, %v1259_v31  ;;  %vm1265_vm6 = vweird.f32 %v1259_v31  ;;  %v1269_v20 = vand.u32 2147483647, %v1259_v31 }
0x1e74   :  { %v1272_v42 = vor.u32 1.1754944e-38, %v1271_v39  ;;  %vm1270_vm8 = vcmp.eq.f32.partialorder %v1269_v20, 8.507059e+37 }
0x1e78   :  { %v1887_v32 = vpop.eup %1886 }
0x1e79   :  { %v1261_v28 = vmul.f32 %v1887_v32, %v1259_v31  ;;  %vm1266_vm4 = vweird.f32 %v1887_v32 }
0x1e7a   :  { %vm1267_vm7 = vmor %vm1265_vm6, %vm1266_vm4 }
0x1e7b   :  { %v1262_v33 = vsub.f32 1.0, %v1261_v28 }
0x1e7d   :  { %v1263_v34 = vmul.f32 %v1887_v32, %v1262_v33 }
0x1e7f   :  { %v1264_v37 = vadd.f32 %v1887_v32, %v1263_v34 }
0x1e81   :  { %v1268_v41 = vsel %vm1267_vm7, %v1887_v32, %v1264_v37 }
0x1e82   :  { %v1273_v46 = vsel %vm1270_vm8, %v1272_v42, %v1268_v41 }
0x1e83   :  { %v1276_v48 = vmul.f32 %v1273_v46, %v1226_v14  ;;  %v1761_v14 = vld [vmem:[%s2299_s12] ss:$0 sm:$0xff] }
0x1ee0   :  { %v1279_v43 = vpop.permute.xlu1 %1278 }
0x1ee1   :  { %v1281_v47 = vmul.f32 %v1279_v43, %v1273_v46 }
0x1ee3   :  { %1283 = vrot.lane.b32.xlu2 %v1281_v47, %s1891_s16 }
0x1f3d   :  { %v1284_v4 = vpop.permute.xlu2 %1283 }
0x1f3e   :  { %v1286_v51 = vadd.f32 %v1284_v4, %v1276_v48 }
0x1f40   :  { %1888 = vtanh.f32 %v1286_v51 }
0x1f46   :  { %v1889_v6 = vpop.eup %1888 }
0x1f47   :  { %1289 = vrot.lane.b32.xlu0 %v1889_v6, %s1891_s16 }
0x1fb9   :  { %v1290_v40 = vpop.permute.xlu0 %1289 }
0x1fba   :  { %v1292_v55 = vmul.f32 %v1290_v40, %v1273_v46 }
0x1fbc   :  { %v1293_v56 = vpack.c.bf16 %v1292_v55, %v1292_v55 }
0x1fbe   :  { %1303 = vrot.lane.b32.xlu1 %v1293_v56, %s1892_s3 }
0x2030   :  { %v1304_v49 = vpop.permute.xlu1 %1303 }
0x2031   :  { %1610 = vmatmul.msk.bf16.vlgmr.msrb.gmra.mxu0 %vm161_vm5, %v1304_v49 }
0x20ae   :  { %v1329_v2 = vpop.f32.mrf.mxu0 }
0x20af   :  { %v1330_v3 = vadd.f32 %v1759_v30, %v1329_v2 }
0x20b1   :  { %v1333_v5 = vmax.f32 %v1330_v3, 0.0 }
0x20b3   :  { %v1334_v8 = vpack.c.bf16 %v1333_v5, %v1333_v5 }
0x20b5   :  { %1411 = vmatmul.bf16.vlgmr.msrb.gmra.mxu3 %v1334_v8 }
0x20b6   :  { %v1331_v9 = vpop.f32.mrf.mxu0 }
0x2138   :  { %v1412_v12 = vpop.f32.mrf.mxu3 }
0x2139   :  { %v1413_v38 = vadd.f32 %v1760_v52, %v1412_v12 }
0x213b   :  { %v1416_v13 = vmax.f32 %v1413_v38, 0.0 }
0x213d   :  { %v1417_v15 = vpack.c.bf16 %v1416_v13, %v1416_v13 }
0x213f   :  { %1494 = vmatmul.bf16.vlgmr.msrb.gmra.mxu1 %v1417_v15 }
0x2140   :  { %v1414_v16 = vpop.f32.mrf.mxu3 }
0x21bc   :  { %v1495_v17 = vpop.f32.mrf.mxu1 }
0x21bd   :  { %v1496_v18 = vadd.f32 %v1761_v14, %v1495_v17 }
0x21bf   :  { %1499 = vst [vmem:[%s2300_s13] sm:$0xff] %v1496_v18 }
0x21c4   :  { %v1497_v19 = vpop.f32.mrf.mxu1 }

</bundles_post_ra>
